<compile_context>
chip_gen: v7x
topology: tpu7x:2x2x1
jax: 0.10.0
libtpu: 0.0.40
codegen_flags: <defaults>
</compile_context>

<pallas_src>
import functools

import numpy as np
import jax
import jax.numpy as jnp
from jax.experimental import pallas as pl
from jax.experimental.pallas import tpu as pltpu

LANE = 128
SUBLANE = 8


def _gelu(x):
    # tanh approximation -> transcendental work goes to the EUP slot.
    return jax.nn.gelu(x, approximate=True)


def _gelu_exact(x):
    # torch.nn.GELU() default (exact erf) -- used for the loose semantics check.
    return jax.nn.gelu(x, approximate=False)


def _round_up(n, m):
    return ((n + m - 1) // m) * m


def _pad_last(a, target):
    pad = target - a.shape[-1]
    if pad == 0:
        return a
    widths = [(0, 0)] * (a.ndim - 1) + [(0, pad)]
    return jnp.pad(a, widths)


# ---------------------------------------------------------------------------
# Kernel
# ---------------------------------------------------------------------------
def mlp_kernel(xm_ref, xt_ref, xb_ref, w1_ref, b1_ref, wp_ref, bp_ref,
               w2_ref, b2_ref, o_ref, hpad_ref, *, img_h, cdtype):
    """One (batch, row-tile) grid step.

    xm_ref   : (1, TH, W, C)   bf16   rows [r*TH, r*TH+TH)
    xt_ref   : (1, 1, W, C)    bf16   row  max(r*TH-1, 0)     (top halo)
    xb_ref   : (1, 1, W, C)    bf16   row  min(r*TH+TH, H-1)  (bottom halo)
    o_ref    : (1, TH, W, C)
    hpad_ref : (TH+2, WS, Ch)  cdtype GELU(fc1); data in cols 1..W, cols 0 and
                                      W+1 are the horizontal zero padding.
    """
    _, TH, W, _ = xm_ref.shape
    Ch = w1_ref.shape[1]
    THp2 = TH + 2

    r = pl.program_id(1)
    row0 = r * TH

    # ---- fused fc1 + GELU over the TH main rows and both 1-row halos ------
    x_all = jnp.concatenate([xt_ref[0], xm_ref[0], xb_ref[0]], axis=0)  # (TH+2, W, C)
    h = jnp.dot(x_all.reshape(THp2 * W, -1), w1_ref[...],
                preferred_element_type=jnp.float32) + b1_ref[...]
    h = _gelu(h).reshape(THp2, W, Ch)

    # Row-validity mask: zeroes the halo rows at the image top/bottom
    # (reproducing the depthwise conv's padding=1) and any rows of a partial
    # last tile that lie beyond the image.  Replaces per-step scratch zeroing.
    gr = row0 - 1 + jax.lax.broadcasted_iota(jnp.int32, (THp2, 1, 1), 0)
    h = jnp.where((gr >= 0) & (gr < img_h), h, 0.0)

    # ---- store GELU(fc1) into the column-padded scratch --------------------
    # Only columns 0 and W+1 are ever read as padding; columns past W+1 are
    # never touched, so no full-scratch zeroing is needed.
    zcol = jnp.zeros((THp2, 1, Ch), cdtype)
    hpad_ref[:, 0:1, :] = zcol
    hpad_ref[:, W + 1:W + 2, :] = zcol
    hpad_ref[:, 1:W + 1, :] = h.astype(cdtype)

    # ---- 3x3 depthwise conv: 9 static-offset taps (cdtype math) -----------
    # TODO(synk): the kx=1,2 tap reads (and the interior store above) are
    # sublane-misaligned by one column; a pltpu.roll-based formulation would
    # move that shift onto the otherwise-idle XLU.
    acc = jnp.zeros((TH, W, Ch), cdtype)
    for ky in range(3):
        for kx in range(3):
            acc = acc + hpad_ref[ky:ky + TH, kx:kx + W, :] * wp_ref[ky * 3 + kx, :]
    acc = acc.astype(jnp.float32) + bp_ref[...].reshape(1, 1, Ch)

    # residual + GELU, then fc2 (bf16 MXU operands, f32 accumulation)
    h_c = hpad_ref[1:TH + 1, 1:W + 1, :].astype(jnp.float32)
    h2 = (h_c + _gelu(acc)).reshape(TH * W, Ch).astype(jnp.bfloat16)

    out = jnp.dot(h2, w2_ref[...], preferred_element_type=jnp.float32) + b2_ref[...]
    o_ref[0] = out.reshape(TH, W, -1).astype(o_ref.dtype)


# ---------------------------------------------------------------------------
# VMEM budgeting / tile selection
# ---------------------------------------------------------------------------
def _vmem_capacity_bytes():
    try:
        return int(pltpu.get_tpu_info().vmem_capacity_bytes)
    except Exception:
        return 64 * 2**20          # v7x-safe fallback


def _vmem_bytes(TH, W, Cp, Chp, cbytes):
    bf16, f32 = 2, 4
    WS = _round_up(W + 2, SUBLANE)
    x_blk = 2 * (TH + 2) * W * Cp * bf16               # double-buffered input blocks
    o_blk = 2 * TH * W * Cp * f32                      # double-buffered output block
    wts = 2 * (Cp * Chp * bf16 + Chp * Cp * bf16 + 9 * Chp * cbytes
               + 2 * Chp * f32 + Cp * f32)             # weight blocks (double-buffered)
    hpad = (TH + 2) * WS * Chp * cbytes                # scratch
    live = 2 * (TH + 2) * W * Chp * f32                # h (f32) + temporaries
    live += 2 * TH * W * Chp * cbytes                  # tap accumulators
    return x_blk + o_blk + wts + hpad + live


def _pick_tile_h(B, H, W, Cp, Chp, cbytes, budget_bytes):
    """Largest row tile within the VMEM budget; keeps >=4 tiles when B==1."""
    th_cap = H if B >= 2 else max(1, -(-H // 4))       # megacore work at B==1
    t_max = 1
    for t in range(th_cap, 0, -1):
        if _vmem_bytes(t, W, Cp, Chp, cbytes) <= budget_bytes:
            t_max = t
            break
    best_div = max((d for d in range(1, t_max + 1) if H % d == 0), default=1)
    # Prefer an exact divisor of H (no partial last tile) unless that would
    # cost more than 2x in tile size (e.g. H prime).
    return best_div if best_div * 2 >= t_max else t_max


# ---------------------------------------------------------------------------
# Wrappers
# ---------------------------------------------------------------------------
def mlp_pallas_nhwc(x_nhwc, params, *, tile_h=None,
                    depthwise_dtype=jnp.bfloat16, out_dtype=jnp.float32):
    """Hot path: NHWC in / NHWC out, no layout transposes.

    depthwise_dtype: bf16 (default, best on v6e/v7x) or f32 (use on v5e).
    Channel padding to a multiple of 128 is a no-op when the model dims
    already comply; in a real model weights would be pre-padded / pre-cast.
    """
    w1, b1, wp, bp, w2, b2 = params
    B, H, W, C = x_nhwc.shape
    Ch = w1.shape[1]
    if W % SUBLANE != 0:
        # TODO(synk): pad W (with in-kernel column masking) instead of raising.
        raise ValueError(f"W={W} must be a multiple of {SUBLANE}")

    Cp = _round_up(C, LANE)
    Chp = _round_up(Ch, LANE)
    cdtype = depthwise_dtype
    cbytes = np.dtype(cdtype).itemsize

    # lane-dense, pre-cast operands
    x_p = _pad_last(x_nhwc, Cp).astype(jnp.bfloat16)
    w1_p = _pad_last(jnp.pad(w1, ((0, Cp - C), (0, 0))), Chp).astype(jnp.bfloat16)
    b1_p = _pad_last(b1.reshape(1, Ch), Chp).astype(jnp.float32)
    wp_p = _pad_last(wp.reshape(9, Ch), Chp).astype(cdtype)
    bp_p = _pad_last(bp.reshape(1, Ch), Chp).astype(jnp.float32)
    w2_p = _pad_last(jnp.pad(w2, ((0, Chp - Ch), (0, 0))), Cp).astype(jnp.bfloat16)
    b2_p = _pad_last(b2.reshape(1, C), Cp).astype(jnp.float32)

    cap = _vmem_capacity_bytes()                  # 128 MiB (v5e/v6e) / 64 MiB (v7x)
    budget = int(0.45 * cap)
    if tile_h is None:
        TH = _pick_tile_h(B, H, W, Cp, Chp, cbytes, budget)
    else:
        TH = int(tile_h)
    TH = max(1, min(TH, H))
    n_rt = pl.cdiv(H, TH)                         # partial last tile is masked
    WS = _round_up(W + 2, SUBLANE)

    vmem_need = _vmem_bytes(TH, W, Cp, Chp, cbytes)
    vmem_limit = int(min(max(2 * vmem_need, 32 * 2**20), int(0.85 * cap)))

    kernel = functools.partial(mlp_kernel, img_h=H, cdtype=cdtype)

    def _const(b, r):
        return (0, 0)

    out = pl.pallas_call(
        kernel,
        out_shape=jax.ShapeDtypeStruct((B, H, W, Cp), out_dtype),
        grid_spec=pltpu.PrefetchScalarGridSpec(
            num_scalar_prefetch=0,
            grid=(B, n_rt),
            in_specs=[
                # TH-row main block.
                pl.BlockSpec((1, TH, W, Cp), lambda b, r: (b, r, 0, 0)),
                # 1-row halos with edge-clamped row index (block size 1 along
                # the row axis => block index == row index).
                pl.BlockSpec((1, 1, W, Cp),
                             lambda b, r: (b, jnp.maximum(r * TH - 1, 0), 0, 0)),
                pl.BlockSpec((1, 1, W, Cp),
                             lambda b, r: (b, jnp.minimum(r * TH + TH, H - 1), 0, 0)),
                # Weights / biases: constant block index.
                # TODO(synk): pipeline_mode=pl.Buffered(1) would stop these
                # constant blocks from being double-buffered (saves VMEM on v7x).
                pl.BlockSpec((Cp, Chp), _const),
                pl.BlockSpec((1, Chp), _const),
                pl.BlockSpec((9, Chp), _const),
                pl.BlockSpec((1, Chp), _const),
                pl.BlockSpec((Chp, Cp), _const),
                pl.BlockSpec((1, Cp), _const),
            ],
            out_specs=pl.BlockSpec((1, TH, W, Cp), lambda b, r: (b, r, 0, 0)),
            scratch_shapes=[pltpu.VMEM((TH + 2, WS, Chp), cdtype)],
        ),
        compiler_params=pltpu.CompilerParams(
            dimension_semantics=("parallel", "parallel"),
            vmem_limit_bytes=vmem_limit,
        ),
    )(x_p, x_p, x_p, w1_p, b1_p, wp_p, bp_p, w2_p, b2_p)

    return out[..., :C]


def mlp_pallas(x_nchw, params, *, tile_h=None, depthwise_dtype=jnp.bfloat16):
    # NCHW (PyTorch) convenience wrapper.  In a real model keep activations
    # NHWC end-to-end and call mlp_pallas_nhwc directly: these transposes are
    # full HBM round trips and pure layout plumbing.
    x = jnp.transpose(x_nchw, (0, 2, 3, 1))
    out = mlp_pallas_nhwc(x, params, tile_h=tile_h, depthwise_dtype=depthwise_dtype)
    return jnp.transpose(out, (0, 3, 1, 2))


# ---------------------------------------------------------------------------
# Pure-JAX references
# ---------------------------------------------------------------------------
def _mlp_ref_nhwc(x, params, *, matmul_dtype, depthwise_dtype, gelu):
    w1, b1, wp, bp, w2, b2 = params
    B, H, W, C = x.shape
    h = jnp.einsum('bhwc,cd->bhwd', x.astype(matmul_dtype),
                   w1.astype(matmul_dtype),
                   preferred_element_type=jnp.float32) + b1
    h = gelu(h).astype(depthwise_dtype)                 # matches the scratch dtype
    hp = jnp.pad(h, ((0, 0), (1, 1), (1, 1), (0, 0)))
    wp_c = wp.astype(depthwise_dtype)
    acc = jnp.zeros_like(h)
    for ky in range(3):
        for kx in range(3):
            acc = acc + hp[:, ky:ky + H, kx:kx + W, :] * wp_c[ky, kx, :]
    acc = acc.astype(jnp.float32) + bp
    h2 = h.astype(jnp.float32) + gelu(acc)
    out = jnp.einsum('bhwd,dc->bhwc', h2.astype(matmul_dtype),
                     w2.astype(matmul_dtype),
                     preferred_element_type=jnp.float32) + b2
    return out


def mlp_reference(x_nchw, params):
    """Same math as the kernel (bf16 matmuls, bf16 depthwise, tanh GELU)."""
    x = jnp.transpose(x_nchw, (0, 2, 3, 1))
    out = _mlp_ref_nhwc(x, params, matmul_dtype=jnp.bfloat16,
                        depthwise_dtype=jnp.bfloat16, gelu=_gelu)
    return jnp.transpose(out, (0, 3, 1, 2))


def mlp_reference_exact(x_nchw, params):
    """torch-default math (f32 operands, exact erf GELU)."""
    x = jnp.transpose(x_nchw, (0, 2, 3, 1))
    out = _mlp_ref_nhwc(x, params, matmul_dtype=jnp.float32,
                        depthwise_dtype=jnp.float32, gelu=_gelu_exact)
    return jnp.transpose(out, (0, 3, 1, 2))


def init_params(key, dim, mlp_ratio=4):
    Ch = dim * mlp_ratio
    ks = jax.random.split(key, 6)
    # fc1: Conv2d(dim, Ch, 1)  -> stored as (dim, Ch)
    w1 = jax.random.normal(ks[0], (dim, Ch), jnp.float32) * 0.1
    b1 = jax.random.normal(ks[1], (Ch,), jnp.float32) * 0.1
    # pos: Conv2d(Ch, Ch, 3, padding=1, groups=Ch) -> stored (3, 3, Ch)
    wp = jax.random.normal(ks[2], (3, 3, Ch), jnp.float32) * 0.1
    bp = jax.random.normal(ks[3], (Ch,), jnp.float32) * 0.1
    # fc2: Conv2d(Ch, dim, 1) -> stored (Ch, dim)
    w2 = jax.random.normal(ks[4], (Ch, dim), jnp.float32) * 0.1
    b2 = jax.random.normal(ks[5], (dim,), jnp.float32) * 0.1
    return (w1, b1, wp, bp, w2, b2)


if __name__ == "__main__":
    key = jax.random.PRNGKey(0)
    k_x, k_p = jax.random.split(key)

    B, dim, H, W = 2, 4, 16, 16
    x = jax.random.normal(k_x, (B, dim, H, W), jnp.float32)   # NCHW, like PyTorch
    params = init_params(k_p, dim, mlp_ratio=4)

    # Explicit row tiling (4 tiles/image): exercises interior tiles and both
    # image-boundary tiles of the halo-clamp / row-mask logic.
    y = jax.block_until_ready(mlp_pallas(x, params, tile_h=4))
    # Auto (VMEM-budgeted) tile size.
    y_auto = jax.block_until_ready(mlp_pallas(x, params))

    y_ref = mlp_reference(x, params)          # replicates kernel math
    y_exact = mlp_reference_exact(x, params)  # exact-erf f32 reference

    assert y.shape == (B, dim, H, W)
    # Kernel vs kernel-math reference: tolerance covers XLA excess-precision
    # handling of the bf16 tap accumulation vs Mosaic's true-bf16 path.
    assert jnp.allclose(y, y_ref, rtol=2e-2, atol=2e-2), \
        "mismatch vs kernel-math reference"
    assert jnp.allclose(y_auto, y_ref, rtol=2e-2, atol=2e-2), \
        "mismatch (auto tile) vs kernel-math reference"
    # Loose semantics check vs exact-erf f32 reference (tanh GELU + bf16
    # MXU operands + bf16 depthwise).
    assert jnp.allclose(y, y_exact, rtol=5e-2, atol=8e-2), \
        "mismatch vs exact-erf f32 reference"

    print("KERNEL_OK")
</pallas_src>

<mosaic_0001>
module attributes {stable_mosaic.version = 11 : i64} {
  func.func @mlp_kernel(%arg0: i32, %arg1: i32, %arg2: memref<1x4x16x128xbf16, #tpu.memory_space<vmem>>, %arg3: memref<1x1x16x128xbf16, #tpu.memory_space<vmem>>, %arg4: memref<1x1x16x128xbf16, #tpu.memory_space<vmem>>, %arg5: memref<128x128xbf16, #tpu.memory_space<vmem>>, %arg6: memref<1x128xf32, #tpu.memory_space<vmem>>, %arg7: memref<9x128xbf16, #tpu.memory_space<vmem>>, %arg8: memref<1x128xf32, #tpu.memory_space<vmem>>, %arg9: memref<128x128xbf16, #tpu.memory_space<vmem>>, %arg10: memref<1x128xf32, #tpu.memory_space<vmem>>, %arg11: memref<1x4x16x128xf32, #tpu.memory_space<vmem>>, %arg12: memref<6x24x128xbf16, #tpu.memory_space<vmem>>) attributes {dimension_semantics = [#tpu.dimension_semantics<parallel>, #tpu.dimension_semantics<parallel>], iteration_bounds = array<i64: 2, 4>, scalar_prefetch = 0 : i64, scratch_operands = 1 : i64, tpu.core_type = #tpu.core_type<tc>, window_params = [{transform_indices = @transform_0, window_bounds = array<i64: 1, 4, 16, 128>}, {transform_indices = @transform_1, window_bounds = array<i64: 1, 1, 16, 128>}, {transform_indices = @transform_2, window_bounds = array<i64: 1, 1, 16, 128>}, {pipeline_mode = #tpu.pipeline_mode<synchronous>, transform_indices = @transform_3, window_bounds = array<i64: 128, 128>}, {pipeline_mode = #tpu.pipeline_mode<synchronous>, transform_indices = @transform_4, window_bounds = array<i64: 1, 128>}, {pipeline_mode = #tpu.pipeline_mode<synchronous>, transform_indices = @transform_5, window_bounds = array<i64: 9, 128>}, {pipeline_mode = #tpu.pipeline_mode<synchronous>, transform_indices = @transform_6, window_bounds = array<i64: 1, 128>}, {pipeline_mode = #tpu.pipeline_mode<synchronous>, transform_indices = @transform_7, window_bounds = array<i64: 128, 128>}, {pipeline_mode = #tpu.pipeline_mode<synchronous>, transform_indices = @transform_8, window_bounds = array<i64: 1, 128>}, {transform_indices = @transform_9, window_bounds = array<i64: 1, 4, 16, 128>}]} {
    %c4_i32 = arith.constant 4 : i32
    %0 = arith.muli %arg1, %c4_i32 : i32
    %c0 = arith.constant 0 : index
    %c0_0 = arith.constant 0 : index
    %c0_1 = arith.constant 0 : index
    %c0_2 = arith.constant 0 : index
    %1 = vector.load %arg3[%c0, %c0_0, %c0_1, %c0_2] : memref<1x1x16x128xbf16, #tpu.memory_space<vmem>>, vector<1x1x16x128xbf16>
    %2 = vector.shape_cast %1 : vector<1x1x16x128xbf16> to vector<1x16x128xbf16>
    %c0_3 = arith.constant 0 : index
    %c0_4 = arith.constant 0 : index
    %c0_5 = arith.constant 0 : index
    %c0_6 = arith.constant 0 : index
    %3 = vector.load %arg2[%c0_3, %c0_4, %c0_5, %c0_6] : memref<1x4x16x128xbf16, #tpu.memory_space<vmem>>, vector<1x4x16x128xbf16>
    %4 = vector.shape_cast %3 : vector<1x4x16x128xbf16> to vector<4x16x128xbf16>
    %c0_7 = arith.constant 0 : index
    %c0_8 = arith.constant 0 : index
    %c0_9 = arith.constant 0 : index
    %c0_10 = arith.constant 0 : index
    %5 = vector.load %arg4[%c0_7, %c0_8, %c0_9, %c0_10] : memref<1x1x16x128xbf16, #tpu.memory_space<vmem>>, vector<1x1x16x128xbf16>
    %6 = vector.shape_cast %5 : vector<1x1x16x128xbf16> to vector<1x16x128xbf16>
    %7 = tpu.concatenate %2, %4, %6 in 0 : vector<1x16x128xbf16>, vector<4x16x128xbf16>, vector<1x16x128xbf16> -> vector<6x16x128xbf16>
    %8 = vector.shape_cast %7 : vector<6x16x128xbf16> to vector<96x128xbf16>
    %c0_11 = arith.constant 0 : index
    %c0_12 = arith.constant 0 : index
    %9 = vector.load %arg5[%c0_11, %c0_12] : memref<128x128xbf16, #tpu.memory_space<vmem>>, vector<128x128xbf16>
    %cst = arith.constant dense<0.000000e+00> : vector<96x128xf32>
    %10 = tpu.matmul %8, %9, %cst {dimension_numbers = #tpu.dot_dimension_numbers<[1], [0], [0], [1], [0, 0, 1, 1], [], []>} : vector<96x128xbf16>, vector<128x128xbf16>, vector<96x128xf32> -> vector<96x128xf32>
    %c0_13 = arith.constant 0 : index
    %c0_14 = arith.constant 0 : index
    %11 = vector.load %arg6[%c0_13, %c0_14] : memref<1x128xf32, #tpu.memory_space<vmem>>, vector<1x128xf32>
    %12 = vector.broadcast %11 : vector<1x128xf32> to vector<96x128xf32>
    %13 = arith.addf %10, %12 : vector<96x128xf32>
    %14 = arith.mulf %13, %13 : vector<96x128xf32>
    %15 = arith.mulf %13, %14 : vector<96x128xf32>
    %cst_15 = arith.constant 4.471500e-02 : f32
    %16 = vector.broadcast %cst_15 : f32 to vector<96x128xf32>
    %17 = arith.mulf %16, %15 : vector<96x128xf32>
    %18 = arith.addf %13, %17 : vector<96x128xf32>
    %cst_16 = arith.constant 0.797884583 : f32
    %19 = vector.broadcast %cst_16 : f32 to vector<96x128xf32>
    %20 = arith.mulf %19, %18 : vector<96x128xf32>
    %21 = math.tanh %20 : vector<96x128xf32>
    %cst_17 = arith.constant 1.000000e+00 : f32
    %22 = vector.broadcast %cst_17 : f32 to vector<96x128xf32>
    %23 = arith.addf %22, %21 : vector<96x128xf32>
    %cst_18 = arith.constant 5.000000e-01 : f32
    %24 = vector.broadcast %cst_18 : f32 to vector<96x128xf32>
    %25 = arith.mulf %24, %23 : vector<96x128xf32>
    %26 = arith.mulf %13, %25 : vector<96x128xf32>
    %27 = vector.shape_cast %26 : vector<96x128xf32> to vector<6x16x128xf32>
    %c1_i32 = arith.constant 1 : i32
    %28 = arith.subi %0, %c1_i32 : i32
    %29 = tpu.iota {dimensions = array<i32: 0>} : vector<6x1x1xi32>
    %30 = vector.broadcast %28 : i32 to vector<6x1x1xi32>
    %31 = arith.addi %30, %29 : vector<6x1x1xi32>
    %c0_i32 = arith.constant 0 : i32
    %32 = vector.broadcast %c0_i32 : i32 to vector<6x1x1xi32>
    %33 = arith.cmpi sge, %31, %32 : vector<6x1x1xi32>
    %c16_i32 = arith.constant 16 : i32
    %34 = vector.broadcast %c16_i32 : i32 to vector<6x1x1xi32>
    %35 = arith.cmpi slt, %31, %34 : vector<6x1x1xi32>
    %36 = arith.andi %33, %35 : vector<6x1x1xi1>
    %cst_19 = arith.constant 0.000000e+00 : f32
    %37 = vector.shape_cast %36 : vector<6x1x1xi1> to vector<6x1x1xi1>
    %38 = vector.broadcast %37 : vector<6x1x1xi1> to vector<6x16x128xi1>
    %39 = vector.broadcast %cst_19 : f32 to vector<6x16x128xf32>
    %40 = arith.select %38, %27, %39 : vector<6x16x128xi1>, vector<6x16x128xf32>
    %cst_20 = arith.constant 0.000000e+00 : bf16
    %41 = vector.broadcast %cst_20 : bf16 to vector<6x1x128xbf16>
    %c0_21 = arith.constant 0 : index
    %c0_22 = arith.constant 0 : index
    %c0_23 = arith.constant 0 : index
    %42 = vector.load %arg12[%c0_21, %c0_22, %c0_23] : memref<6x24x128xbf16, #tpu.memory_space<vmem>>, vector<6x1x128xbf16>
    tpu.vector_store %arg12[%c0_21, %c0_22, %c0_23], %41 {strides = array<i32>} : memref<6x24x128xbf16, #tpu.memory_space<vmem>>, vector<6x1x128xbf16>,
    %c0_24 = arith.constant 0 : index
    %c17 = arith.constant 17 : index
    %c0_25 = arith.constant 0 : index
    %43 = vector.load %arg12[%c0_24, %c17, %c0_25] : memref<6x24x128xbf16, #tpu.memory_space<vmem>>, vector<6x1x128xbf16>
    tpu.vector_store %arg12[%c0_24, %c17, %c0_25], %41 {strides = array<i32>} : memref<6x24x128xbf16, #tpu.memory_space<vmem>>, vector<6x1x128xbf16>,
    %44 = arith.truncf %40 : vector<6x16x128xf32> to vector<6x16x128xbf16>
    %c0_26 = arith.constant 0 : index
    %c1 = arith.constant 1 : index
    %c0_27 = arith.constant 0 : index
    %45 = vector.load %arg12[%c0_26, %c1, %c0_27] : memref<6x24x128xbf16, #tpu.memory_space<vmem>>, vector<6x16x128xbf16>
    tpu.vector_store %arg12[%c0_26, %c1, %c0_27], %44 {strides = array<i32>} : memref<6x24x128xbf16, #tpu.memory_space<vmem>>, vector<6x16x128xbf16>,
    %cst_28 = arith.constant 0.000000e+00 : bf16
    %46 = vector.broadcast %cst_28 : bf16 to vector<4x16x128xbf16>
    %c0_29 = arith.constant 0 : index
    %c0_30 = arith.constant 0 : index
    %c0_31 = arith.constant 0 : index
    %47 = vector.load %arg12[%c0_29, %c0_30, %c0_31] : memref<6x24x128xbf16, #tpu.memory_space<vmem>>, vector<4x16x128xbf16>
    %c0_32 = arith.constant 0 : index
    %c0_33 = arith.constant 0 : index
    %48 = vector.load %arg7[%c0_32, %c0_33] : memref<9x128xbf16, #tpu.memory_space<vmem>>, vector<1x128xbf16>
    %49 = vector.shape_cast %48 : vector<1x128xbf16> to vector<128xbf16>
    %50 = vector.shape_cast %49 : vector<128xbf16> to vector<1x1x128xbf16>
    %51 = vector.broadcast %50 : vector<1x1x128xbf16> to vector<4x16x128xbf16>
    %52 = arith.mulf %47, %51 : vector<4x16x128xbf16>
    %53 = arith.addf %46, %52 : vector<4x16x128xbf16>
    %c0_34 = arith.constant 0 : index
    %c1_35 = arith.constant 1 : index
    %c0_36 = arith.constant 0 : index
    %54 = vector.load %arg12[%c0_34, %c1_35, %c0_36] : memref<6x24x128xbf16, #tpu.memory_space<vmem>>, vector<4x16x128xbf16>
    %c1_37 = arith.constant 1 : index
    %c0_38 = arith.constant 0 : index
    %55 = vector.load %arg7[%c1_37, %c0_38] : memref<9x128xbf16, #tpu.memory_space<vmem>>, vector<1x128xbf16>
    %56 = vector.shape_cast %55 : vector<1x128xbf16> to vector<128xbf16>
    %57 = vector.shape_cast %56 : vector<128xbf16> to vector<1x1x128xbf16>
    %58 = vector.broadcast %57 : vector<1x1x128xbf16> to vector<4x16x128xbf16>
    %59 = arith.mulf %54, %58 : vector<4x16x128xbf16>
    %60 = arith.addf %53, %59 : vector<4x16x128xbf16>
    %c0_39 = arith.constant 0 : index
    %c2 = arith.constant 2 : index
    %c0_40 = arith.constant 0 : index
    %61 = vector.load %arg12[%c0_39, %c2, %c0_40] : memref<6x24x128xbf16, #tpu.memory_space<vmem>>, vector<4x16x128xbf16>
    %c2_41 = arith.constant 2 : index
    %c0_42 = arith.constant 0 : index
    %62 = vector.load %arg7[%c2_41, %c0_42] : memref<9x128xbf16, #tpu.memory_space<vmem>>, vector<1x128xbf16>
    %63 = vector.shape_cast %62 : vector<1x128xbf16> to vector<128xbf16>
    %64 = vector.shape_cast %63 : vector<128xbf16> to vector<1x1x128xbf16>
    %65 = vector.broadcast %64 : vector<1x1x128xbf16> to vector<4x16x128xbf16>
    %66 = arith.mulf %61, %65 : vector<4x16x128xbf16>
    %67 = arith.addf %60, %66 : vector<4x16x128xbf16>
    %c1_43 = arith.constant 1 : index
    %c0_44 = arith.constant 0 : index
    %c0_45 = arith.constant 0 : index
    %68 = vector.load %arg12[%c1_43, %c0_44, %c0_45] : memref<6x24x128xbf16, #tpu.memory_space<vmem>>, vector<4x16x128xbf16>
    %c3 = arith.constant 3 : index
    %c0_46 = arith.constant 0 : index
    %69 = vector.load %arg7[%c3, %c0_46] : memref<9x128xbf16, #tpu.memory_space<vmem>>, vector<1x128xbf16>
    %70 = vector.shape_cast %69 : vector<1x128xbf16> to vector<128xbf16>
    %71 = vector.shape_cast %70 : vector<128xbf16> to vector<1x1x128xbf16>
    %72 = vector.broadcast %71 : vector<1x1x128xbf16> to vector<4x16x128xbf16>
    %73 = arith.mulf %68, %72 : vector<4x16x128xbf16>
    %74 = arith.addf %67, %73 : vector<4x16x128xbf16>
    %c1_47 = arith.constant 1 : index
    %c1_48 = arith.constant 1 : index
    %c0_49 = arith.constant 0 : index
    %75 = vector.load %arg12[%c1_47, %c1_48, %c0_49] : memref<6x24x128xbf16, #tpu.memory_space<vmem>>, vector<4x16x128xbf16>
    %c4 = arith.constant 4 : index
    %c0_50 = arith.constant 0 : index
    %76 = vector.load %arg7[%c4, %c0_50] : memref<9x128xbf16, #tpu.memory_space<vmem>>, vector<1x128xbf16>
    %77 = vector.shape_cast %76 : vector<1x128xbf16> to vector<128xbf16>
    %78 = vector.shape_cast %77 : vector<128xbf16> to vector<1x1x128xbf16>
    %79 = vector.broadcast %78 : vector<1x1x128xbf16> to vector<4x16x128xbf16>
    %80 = arith.mulf %75, %79 : vector<4x16x128xbf16>
    %81 = arith.addf %74, %80 : vector<4x16x128xbf16>
    %c1_51 = arith.constant 1 : index
    %c2_52 = arith.constant 2 : index
    %c0_53 = arith.constant 0 : index
    %82 = vector.load %arg12[%c1_51, %c2_52, %c0_53] : memref<6x24x128xbf16, #tpu.memory_space<vmem>>, vector<4x16x128xbf16>
    %c5 = arith.constant 5 : index
    %c0_54 = arith.constant 0 : index
    %83 = vector.load %arg7[%c5, %c0_54] : memref<9x128xbf16, #tpu.memory_space<vmem>>, vector<1x128xbf16>
    %84 = vector.shape_cast %83 : vector<1x128xbf16> to vector<128xbf16>
    %85 = vector.shape_cast %84 : vector<128xbf16> to vector<1x1x128xbf16>
    %86 = vector.broadcast %85 : vector<1x1x128xbf16> to vector<4x16x128xbf16>
    %87 = arith.mulf %82, %86 : vector<4x16x128xbf16>
    %88 = arith.addf %81, %87 : vector<4x16x128xbf16>
    %c2_55 = arith.constant 2 : index
    %c0_56 = arith.constant 0 : index
    %c0_57 = arith.constant 0 : index
    %89 = vector.load %arg12[%c2_55, %c0_56, %c0_57] : memref<6x24x128xbf16, #tpu.memory_space<vmem>>, vector<4x16x128xbf16>
    %c6 = arith.constant 6 : index
    %c0_58 = arith.constant 0 : index
    %90 = vector.load %arg7[%c6, %c0_58] : memref<9x128xbf16, #tpu.memory_space<vmem>>, vector<1x128xbf16>
    %91 = vector.shape_cast %90 : vector<1x128xbf16> to vector<128xbf16>
    %92 = vector.shape_cast %91 : vector<128xbf16> to vector<1x1x128xbf16>
    %93 = vector.broadcast %92 : vector<1x1x128xbf16> to vector<4x16x128xbf16>
    %94 = arith.mulf %89, %93 : vector<4x16x128xbf16>
    %95 = arith.addf %88, %94 : vector<4x16x128xbf16>
    %c2_59 = arith.constant 2 : index
    %c1_60 = arith.constant 1 : index
    %c0_61 = arith.constant 0 : index
    %96 = vector.load %arg12[%c2_59, %c1_60, %c0_61] : memref<6x24x128xbf16, #tpu.memory_space<vmem>>, vector<4x16x128xbf16>
    %c7 = arith.constant 7 : index
    %c0_62 = arith.constant 0 : index
    %97 = vector.load %arg7[%c7, %c0_62] : memref<9x128xbf16, #tpu.memory_space<vmem>>, vector<1x128xbf16>
    %98 = vector.shape_cast %97 : vector<1x128xbf16> to vector<128xbf16>
    %99 = vector.shape_cast %98 : vector<128xbf16> to vector<1x1x128xbf16>
    %100 = vector.broadcast %99 : vector<1x1x128xbf16> to vector<4x16x128xbf16>
    %101 = arith.mulf %96, %100 : vector<4x16x128xbf16>
    %102 = arith.addf %95, %101 : vector<4x16x128xbf16>
    %c2_63 = arith.constant 2 : index
    %c2_64 = arith.constant 2 : index
    %c0_65 = arith.constant 0 : index
    %103 = vector.load %arg12[%c2_63, %c2_64, %c0_65] : memref<6x24x128xbf16, #tpu.memory_space<vmem>>, vector<4x16x128xbf16>
    %c8 = arith.constant 8 : index
    %c0_66 = arith.constant 0 : index
    %104 = vector.load %arg7[%c8, %c0_66] : memref<9x128xbf16, #tpu.memory_space<vmem>>, vector<1x128xbf16>
    %105 = vector.shape_cast %104 : vector<1x128xbf16> to vector<128xbf16>
    %106 = vector.shape_cast %105 : vector<128xbf16> to vector<1x1x128xbf16>
    %107 = vector.broadcast %106 : vector<1x1x128xbf16> to vector<4x16x128xbf16>
    %108 = arith.mulf %103, %107 : vector<4x16x128xbf16>
    %109 = arith.addf %102, %108 : vector<4x16x128xbf16>
    %110 = arith.extf %109 : vector<4x16x128xbf16> to vector<4x16x128xf32>
    %c0_67 = arith.constant 0 : index
    %c0_68 = arith.constant 0 : index
    %111 = vector.load %arg8[%c0_67, %c0_68] : memref<1x128xf32, #tpu.memory_space<vmem>>, vector<1x128xf32>
    %112 = vector.shape_cast %111 : vector<1x128xf32> to vector<1x1x128xf32>
    %113 = vector.broadcast %112 : vector<1x1x128xf32> to vector<4x16x128xf32>
    %114 = arith.addf %110, %113 : vector<4x16x128xf32>
    %c1_69 = arith.constant 1 : index
    %c1_70 = arith.constant 1 : index
    %c0_71 = arith.constant 0 : index
    %115 = vector.load %arg12[%c1_69, %c1_70, %c0_71] : memref<6x24x128xbf16, #tpu.memory_space<vmem>>, vector<4x16x128xbf16>
    %116 = arith.extf %115 : vector<4x16x128xbf16> to vector<4x16x128xf32>
    %117 = arith.mulf %114, %114 : vector<4x16x128xf32>
    %118 = arith.mulf %114, %117 : vector<4x16x128xf32>
    %cst_72 = arith.constant 4.471500e-02 : f32
    %119 = vector.broadcast %cst_72 : f32 to vector<4x16x128xf32>
    %120 = arith.mulf %119, %118 : vector<4x16x128xf32>
    %121 = arith.addf %114, %120 : vector<4x16x128xf32>
    %cst_73 = arith.constant 0.797884583 : f32
    %122 = vector.broadcast %cst_73 : f32 to vector<4x16x128xf32>
    %123 = arith.mulf %122, %121 : vector<4x16x128xf32>
    %124 = math.tanh %123 : vector<4x16x128xf32>
    %cst_74 = arith.constant 1.000000e+00 : f32
    %125 = vector.broadcast %cst_74 : f32 to vector<4x16x128xf32>
    %126 = arith.addf %125, %124 : vector<4x16x128xf32>
    %cst_75 = arith.constant 5.000000e-01 : f32
    %127 = vector.broadcast %cst_75 : f32 to vector<4x16x128xf32>
    %128 = arith.mulf %127, %126 : vector<4x16x128xf32>
    %129 = arith.mulf %114, %128 : vector<4x16x128xf32>
    %130 = arith.addf %116, %129 : vector<4x16x128xf32>
    %131 = vector.shape_cast %130 : vector<4x16x128xf32> to vector<64x128xf32>
    %132 = arith.truncf %131 : vector<64x128xf32> to vector<64x128xbf16>
    %c0_76 = arith.constant 0 : index
    %c0_77 = arith.constant 0 : index
    %133 = vector.load %arg9[%c0_76, %c0_77] : memref<128x128xbf16, #tpu.memory_space<vmem>>, vector<128x128xbf16>
    %cst_78 = arith.constant dense<0.000000e+00> : vector<64x128xf32>
    %134 = tpu.matmul %132, %133, %cst_78 {dimension_numbers = #tpu.dot_dimension_numbers<[1], [0], [0], [1], [0, 0, 1, 1], [], []>} : vector<64x128xbf16>, vector<128x128xbf16>, vector<64x128xf32> -> vector<64x128xf32>
    %c0_79 = arith.constant 0 : index
    %c0_80 = arith.constant 0 : index
    %135 = vector.load %arg10[%c0_79, %c0_80] : memref<1x128xf32, #tpu.memory_space<vmem>>, vector<1x128xf32>
    %136 = vector.broadcast %135 : vector<1x128xf32> to vector<64x128xf32>
    %137 = arith.addf %134, %136 : vector<64x128xf32>
    %138 = vector.shape_cast %137 : vector<64x128xf32> to vector<4x16x128xf32>
    %c0_81 = arith.constant 0 : index
    %c0_82 = arith.constant 0 : index
    %c0_83 = arith.constant 0 : index
    %c0_84 = arith.constant 0 : index
    %139 = vector.load %arg11[%c0_81, %c0_82, %c0_83, %c0_84] : memref<1x4x16x128xf32, #tpu.memory_space<vmem>>, vector<1x4x16x128xf32>
    %140 = vector.shape_cast %139 : vector<1x4x16x128xf32> to vector<4x16x128xf32>
    %141 = vector.shape_cast %138 : vector<4x16x128xf32> to vector<1x4x16x128xf32>
    tpu.vector_store %arg11[%c0_81, %c0_82, %c0_83, %c0_84], %141 {strides = array<i32>} : memref<1x4x16x128xf32, #tpu.memory_space<vmem>>, vector<1x4x16x128xf32>,
    return
  }
  func.func @transform_0(%arg0: i32, %arg1: i32) -> (i32, i32, i32, i32) {
    %c0_i32 = arith.constant 0 : i32
    %c0_i32_0 = arith.constant 0 : i32
    %c0_i32_1 = arith.constant 0 : i32
    return %arg0, %arg1, %c0_i32, %c0_i32_0 : i32, i32, i32, i32
  }
  func.func @transform_1(%arg0: i32, %arg1: i32) -> (i32, i32, i32, i32) {
    %c4_i32 = arith.constant 4 : i32
    %0 = arith.muli %arg1, %c4_i32 : i32
    %c1_i32 = arith.constant 1 : i32
    %1 = arith.subi %0, %c1_i32 : i32
    %c0_i32 = arith.constant 0 : i32
    %2 = arith.maxsi %1, %c0_i32 : i32
    %c0_i32_0 = arith.constant 0 : i32
    %c0_i32_1 = arith.constant 0 : i32
    %c0_i32_2 = arith.constant 0 : i32
    return %arg0, %2, %c0_i32_0, %c0_i32_1 : i32, i32, i32, i32
  }
  func.func @transform_2(%arg0: i32, %arg1: i32) -> (i32, i32, i32, i32) {
    %c4_i32 = arith.constant 4 : i32
    %0 = arith.muli %arg1, %c4_i32 : i32
    %c4_i32_0 = arith.constant 4 : i32
    %1 = arith.addi %0, %c4_i32_0 : i32
    %c15_i32 = arith.constant 15 : i32
    %2 = arith.minsi %1, %c15_i32 : i32
    %c0_i32 = arith.constant 0 : i32
    %c0_i32_1 = arith.constant 0 : i32
    %c0_i32_2 = arith.constant 0 : i32
    return %arg0, %2, %c0_i32, %c0_i32_1 : i32, i32, i32, i32
  }
  func.func @transform_3(%arg0: i32, %arg1: i32) -> (i32, i32) {
    %c0_i32 = arith.constant 0 : i32
    %c0_i32_0 = arith.constant 0 : i32
    %c0_i32_1 = arith.constant 0 : i32
    return %c0_i32, %c0_i32_0 : i32, i32
  }
  func.func @transform_4(%arg0: i32, %arg1: i32) -> (i32, i32) {
    %c0_i32 = arith.constant 0 : i32
    %c0_i32_0 = arith.constant 0 : i32
    %c0_i32_1 = arith.constant 0 : i32
    return %c0_i32, %c0_i32_0 : i32, i32
  }
  func.func @transform_5(%arg0: i32, %arg1: i32) -> (i32, i32) {
    %c0_i32 = arith.constant 0 : i32
    %c0_i32_0 = arith.constant 0 : i32
    %c0_i32_1 = arith.constant 0 : i32
    return %c0_i32, %c0_i32_0 : i32, i32
  }
  func.func @transform_6(%arg0: i32, %arg1: i32) -> (i32, i32) {
    %c0_i32 = arith.constant 0 : i32
    %c0_i32_0 = arith.constant 0 : i32
    %c0_i32_1 = arith.constant 0 : i32
    return %c0_i32, %c0_i32_0 : i32, i32
  }
  func.func @transform_7(%arg0: i32, %arg1: i32) -> (i32, i32) {
    %c0_i32 = arith.constant 0 : i32
    %c0_i32_0 = arith.constant 0 : i32
    %c0_i32_1 = arith.constant 0 : i32
    return %c0_i32, %c0_i32_0 : i32, i32
  }
  func.func @transform_8(%arg0: i32, %arg1: i32) -> (i32, i32) {
    %c0_i32 = arith.constant 0 : i32
    %c0_i32_0 = arith.constant 0 : i32
    %c0_i32_1 = arith.constant 0 : i32
    return %c0_i32, %c0_i32_0 : i32, i32
  }
  func.func @transform_9(%arg0: i32, %arg1: i32) -> (i32, i32, i32, i32) {
    %c0_i32 = arith.constant 0 : i32
    %c0_i32_0 = arith.constant 0 : i32
    %c0_i32_1 = arith.constant 0 : i32
    return %arg0, %arg1, %c0_i32, %c0_i32_0 : i32, i32, i32, i32
  }
}

</mosaic_0001>

<bundles_post_ra>
// kernel: tpu_custom_call.1
= control target key start
LH: loop header
LB: loop body
LE: loop exit
PB: predicated region body
PF: predicated region fallthrough
CT: control target
= control target key end

     0   :  { %s4466_s0 = inlined_call_operand.hbm [shape: bf16[2,16,16,128], index: 0, kind: input, shape index: {}]   ;;  %s4467_s1 = inlined_call_operand.hbm [shape: bf16[2,16,16,128], index: 1, kind: input, shape index: {}]   ;;  %s4468_s2 = inlined_call_operand.hbm [shape: bf16[2,16,16,128], index: 2, kind: input, shape index: {}]   ;;  %s4469_s3 = inlined_call_operand.hbm [shape: bf16[128,128], index: 3, kind: input, shape index: {}]   ;;  %s4470_s4 = inlined_call_operand.vmem [shape: f32[1,128], index: 4, kind: input, shape index: {}]   ;;  %s4471_s5 = inlined_call_operand.vmem [shape: bf16[9,128], index: 5, kind: input, shape index: {}]   ;;  %s4472_s6 = inlined_call_operand.vmem [shape: f32[1,128], index: 6, kind: input, shape index: {}]   ;;  %s4473_s7 = inlined_call_operand.hbm [shape: bf16[128,128], index: 7, kind: input, shape index: {}]   ;;  %s4474_s8 = inlined_call_operand.vmem [shape: f32[1,128], index: 8, kind: input, shape index: {}]   ;;  %s4475_s9 = inlined_call_operand.hbm [shape: f32[2,16,16,128], index: 9, kind: output, shape index: {}]  }
   0x1   :  { %4503 = sst [smem:[#allocation31_spill]] %s4466_s0 }
   0x2   :  { %4504 = sst [smem:[#allocation32_spill]] %s4467_s1 }
   0x3   :  { %4505 = sst [smem:[#allocation33_spill]] %s4468_s2 }
   0x4   :  { %4506 = sst [smem:[#allocation34_spill]] %s4469_s3 }
   0x5   :  { %4507 = sst [smem:[#allocation35_spill]] %s4470_s4 }
   0x6   :  { %4508 = sst [smem:[#allocation36_spill]] %s4471_s5 }
   0x7   :  { %4509 = sst [smem:[#allocation37_spill]] %s4472_s6 }
   0x8   :  { %4510 = sst [smem:[#allocation38_spill]] %s4473_s7 }
   0x9   :  { %4511 = sst [smem:[#allocation39_spill]] %s4474_s8 }
   0xa   :  { %4512 = sst [smem:[#allocation40_spill]] %s4475_s9 }
   0xb   :  { %14 = vsyncpa [#allocation4], 0 }
   0xc   :  { %16 = vsyncpa [#allocation4 + $0x1], 0 }
   0xd   :  { %17 = vsyncpa [#allocation7], 0 }
   0xe   :  { %19 = vsyncpa [#allocation7 + $0x1], 0 }
   0xf   :  { %20 = vsyncpa [#allocation10], 0 }
  0x10   :  { %21 = vsyncpa [#allocation5], 0 }
  0x11   :  { %23 = vsyncpa [#allocation5 + $0x1], 0  ;;  %s3203_s30 = smov 0   ;;  %s3205_s10 = smov 0  }
  0x12   :  { %s3207_s11 = smov 0   ;;  %s3209_s12 = smov 0  }
  0x13   :  { %s3211_s13 = smov 0   ;;  %s3213_s14 = smov 0  }
  0x14   :  { %s3215_s15 = smov 0   ;;  %s3217_s16 = smov 0  }
  0x15   :  { %s3219_s17 = smov 0   ;;  %s3221_s18 = smov 0  }
  0x16   :  { %s3223_s19 = smov 0   ;;  %s3225_s20 = smov 0  }
  0x17   :  { %s3227_s21 = smov 0   ;;  %s3229_s22 = smov 0  }
  0x18 LB: > { %4513 = sst [smem:[#allocation18_spill]] %s3089_s30  ;;  %s3274_s23 = sadd.s32 4294967295, %s3141_s22   ;;  %s3141_s22 = sphi %s3229_s22, %s29_s22   ;;  %s3137_s21 = sphi %s3227_s21, %s4613_s21   ;;  %s3133_s20 = sphi %s3225_s20, %s4612_s20   ;;  %s3129_s19 = sphi %s3223_s19, %s4622_s19   ;;  %s3125_s18 = sphi %s3221_s18, %s4610_s18   ;;  %s3121_s17 = sphi %s3219_s17, %s4621_s17   ;;  %s3117_s16 = sphi %s3217_s16, %s4620_s16   ;;  %s3113_s15 = sphi %s3215_s15, %s4619_s15   ;;  %s3109_s14 = sphi %s3213_s14, %s4618_s14   ;;  %s3105_s13 = sphi %s3211_s13, %s4617_s13   ;;  %s3101_s12 = sphi %s3209_s12, %s4616_s12   ;;  %s3097_s11 = sphi %s3207_s11, %s4615_s11   ;;  %s3093_s10 = sphi %s3205_s10, %s4607_s10   ;;  %s3089_s30 = sphi %s3203_s30, %s4606_s30  }
  0x19   : > { %4514 = sst [smem:[#allocation19_spill]] %s3093_s10  ;;  %p2428_p0 = scmp.ge.s32.totalorder %s3141_s22, 1 }
  0x1a   : > { %4515 = sst [smem:[#allocation20_spill]] %s3097_s11  ;;  %p4477_p1 = scmp.eq.s32.totalorder %s3274_s23, 0 }
  0x1b   : > { %4516 = sst [smem:[#allocation21_spill]] %s3105_s13  ;;  %p300_p3 = scmp.lt.s32.totalorder %s3141_s22, 9 }
  0x1c   : > { %4517 = sst [smem:[#allocation22_spill]] %s3125_s18  ;;  %s3143_s25 = smov [#allocation9]  }
  0x1d   : > { %4518 = sst [smem:[#allocation23_spill]] %s3129_s19  ;;  %p3280_p4 = pnand %p2428_p0, %p300_p3 }
  0x1e   : > { %4519 = sst [smem:[#allocation24_spill]] %s3133_s20  ;;  %s312_s26 = sshll.u32 %s3143_s25, 4  ;;  %s313_s26 = int_to_ptr.vmem [resolvable:$true] %s312_s26 }
  0x1f   : > { %4520 = sst [smem:[#allocation25_spill]] %s3137_s21  ;;  %p2630_p5 = pneg %p3280_p4 }
  0x20   : > { %s4521_s24 = scalar_select %p3280_p4, 1, 0 }
  0x21   : > { %p3288_p6 = pnand %p2630_p5, %p4477_p1  ;;  %s4524_s3 = sld [smem:[#allocation34_spill]] }
  0x22   : > { %4522 = sst [smem:[#allocation26_spill]] %s4521_s24 }
  0x23   : > { %p4497_p8 = pneg %p3288_p6 }
  0x27   : > { %s2837_s9 = scalar_lea.hbm %s4524_s3, 1024 }
  0x28   : > { %p2838_p7 = scmp.ne.s32.totalorder %s4524_s3, %s2837_s9  ;;  %p2844_p11 = scmp.lt.u32.totalorder %s2837_s9, %s4524_s3 }
  0x2a   : > { %p2840_p9 = pnand %p4497_p8, %p2838_p7 }
  0x2c   : > { %p2841_p10 = pneg %p2840_p9 }
  0x2e   : > { %p2846_p12 = pnand %p2844_p11, %p2841_p10 }
  0x30   : > { %2849 = shalt.err (!%p2846_p12)
}
  0x31   : > { %s2850_s28 = scalar_lea.vmem %s313_s26, 1024  ;;  %p2858_p5 = scmp.lt.s32.totalorder %s313_s26, %s313_s26 }
  0x32   : > { %p2851_p13 = scmp.ne.s32.totalorder %s313_s26, %s2850_s28  ;;  %p2859_p2 = scmp.lt.s32.totalorder %s2850_s28, %s2850_s28 }
  0x34   : > { %p2853_p0 = pnand %p2851_p13, %p4497_p8  ;;  %p2860_p1 = por %p2859_p2, %p2858_p5 }
  0x36   : > { %p2854_p3 = pneg %p2853_p0 }
  0x38   : > { %p2861_p4 = pnand %p2860_p1, %p2854_p3 }
  0x3a   : > { %2864 = shalt.err (!%p2861_p4)
}
  0x3b   : > { %s4481_s8 = smov 64   ;;  %s4483_s6 = smov 4  }
  0x3c   : > { %2633 = dma.hbm_to_vmem [thread:$0]  (!%p3288_p6), %s4524_s3, 1024, %s313_s26, [#allocation10], %s4481_s8, %s4481_s8, %s4483_s6  }
  0x3d   : > { %s38_s29 = sadd.s32 1, %s3133_s20  ;;  %s41_s25 = sadd.s32 1, %s3137_s21 }
  0x3e   : > { %p39_p1 = scmp.ge.s32.totalorder %s38_s29, 4  ;;  %p4496_p2 = scmp.eq.s32.totalorder %s3141_s22, 0 }
  0x3f   : > { %s2422_s28 = sshll.u32 %s3133_s20, 2  ;;  %s86_s4 = sadd.s32 1, %s3109_s14 }
  0x40   : > { %s4624_s29 = smov (%p39_p1, %s38_s29), 0  ;;  %s4626_s25 = smov (!%p39_p1, %s41_s25), %s3137_s21 }
  0x41   : > { %4525 = sst [smem:[#allocation27_spill]] %s4624_s29  ;;  %s46_s5 = ssub.s32 %s3133_s20, %s4624_s29 }
  0x42   : > { %s2423_s18 = sadd.s32 4294967295, %s2422_s28  ;;  %p43_p4 = scmp.ge.s32.totalorder %s4626_s25, 2 }
  0x43   : > { %p75_p7 = scmp.gt.s32.totalorder %s2423_s18, 0  ;;  %s2424_s26 = sshll.u32 %s4624_s29, 2 }
  0x44   : > { %p93_p9 = scmp.ne.s32.totalorder %s3109_s14, %s3105_s13  ;;  %s4628_s25 = smov (%p43_p4, %s4626_s25), 0 }
  0x45   : > { %4526 = sst [smem:[#allocation28_spill]] %s4628_s25  ;;  %s4630_s18 = smov (!%p75_p7, %s2423_s18), 0 }
  0x46   : > { %s3334_s9 = ssub.s32 %s3137_s21, %s4628_s25  ;;  %s2425_s19 = sadd.s32 4294967295, %s2424_s26 }
  0x47   : > { %4527 = sst [smem:[#allocation29_spill]] %s3334_s9  ;;  %s3337_s8 = sor.u32 %s46_s5, %s3334_s9 }
  0x48   : > { %p79_p10 = scmp.gt.s32.totalorder %s2425_s19, 0  ;;  %p3342_p12 = por %p93_p9, %p4496_p2 }
  0x49   : > { %p99_p13 = scmp.ne.s32.totalorder %s3105_s13, %s3101_s12  ;;  %s3348_s3 = sadd.s32 4, %s2422_s28 }
  0x4a   : > { %s4632_s19 = smov (!%p79_p10, %s2425_s19), 0  ;;  %p4529_p3 = scmp.eq.s32.totalorder %s3274_s23, 0 }
  0x4b   : > { %s82_s25 = ssub.s32 %s4630_s18, %s4632_s19  ;;  %s3358_s24 = sadd.s32 4, %s2424_s26 }
  0x4c   : > { %s83_s5 = sor.u32 %s82_s25, %s3334_s9  ;;  %p3354_p5 = por %p99_p13, %p4529_p3 }
  0x4d   : > { %p84_p1 = scmp.eq.s32.totalorder %s83_s5, 0  ;;  %p4495_p7 = scmp.lt.s32.totalorder %s3141_s22, 8 }
  0x4e   : > { %s4530_s29 = scalar_select %p3354_p5, 1, 0 }
  0x4f   : > { %s3363_s12 = scalar_select %p84_p1, %s3109_s14, %s86_s4  }
  0x50   : > { %4531 = sst [smem:[#allocation30_spill]] %s4530_s29  ;;  %s3366_s28 = sshll.u32 %s3137_s21, 5 }
  0x51   : > { %s375_s19 = sand.u32 1, %s3141_s22   ;;  %s377_s25 = sand.u32 1, %s3109_s14  }
  0x52   : > { %s2437_s13 = sshll.u32 %s377_s25, 3  ;;  %s2440_s2 = sshll.u32 %s4630_s18, 1 }
  0x53   : > { %s389_s9 = sadd.s32 %s2440_s2, %s3366_s28  ;;  %s379_s29 = scalar_lea.vmem [#allocation6], %s2437_s13 }
  0x54   : > { %s2442_s30 = sshll.u32 %s389_s9, 6  ;;  %s392_s5 = sshll.u32 %s379_s29, 4  ;;  %s3376_s5 = int_to_ptr.vmem [resolvable:$true] %s392_s5 }
  0x55   : > { %s4532_s1 = sld [smem:[#allocation32_spill]]  ;;  %p3382_p9 = pnand %p4495_p7, %p3342_p12 }
  0x56   : > { %s3146_s2 = smov [#allocation11]  }
  0x57   : > { %s334_s13 = sshll.u32 %s3146_s2, 4  ;;  %p2867_p13 = pneg %p3382_p9  ;;  %s3386_s13 = int_to_ptr.vmem [resolvable:$true] %s334_s13 }
  0x5b   : > { %s3374_s26 = scalar_lea.hbm %s4532_s1, %s2442_s30  ;;  %s3388_s30 = scalar_lea.sflag [#allocation7], %s375_s19 }
  0x5c   : > { %s2865_s10 = scalar_lea.hbm %s3374_s26, 128  ;;  %s2870_s6 = scalar_lea.hbm %s4532_s1, 4096 }
  0x5d   : > { %p2866_p10 = scmp.ne.s32.totalorder %s3374_s26, %s2865_s10  ;;  %p2871_p12 = scmp.lt.u32.totalorder %s3374_s26, %s4532_s1 }
  0x5e   : > { %p2872_p4 = scmp.lt.u32.totalorder %s2870_s6, %s2865_s10  ;;  %p2874_p7 = scmp.lt.u32.totalorder %s2865_s10, %s3374_s26 }
  0x5f   : > { %p2868_p3 = pnand %p2867_p13, %p2866_p10 }
  0x60   : > { %p2873_p0 = por %p2872_p4, %p2871_p12 }
  0x61   : > { %p2869_p1 = pneg %p2868_p3 }
  0x62   : > { %p2875_p2 = por %p2874_p7, %p2873_p0 }
  0x64   : > { %p2876_p11 = pnand %p2875_p2, %p2869_p1 }
  0x66   : > { %2879 = shalt.err (!%p2876_p11)
}
  0x67   : > { %s2880_s19 = scalar_lea.vmem %s3376_s5, 128  ;;  %s3147_s25 = smov [#allocation6]  }
  0x68   : > { %p2881_p10 = scmp.ne.s32.totalorder %s3376_s5, %s2880_s19  ;;  %s2885_s2 = sshll.u32 %s3147_s25, 4  ;;  %s2886_s2 = int_to_ptr.vmem [resolvable:$false] %s2885_s2 }
  0x69   : > { %s2887_s11 = scalar_lea.vmem %s2886_s2, 256  ;;  %p2888_p5 = scmp.lt.s32.totalorder %s3376_s5, %s2886_s2 }
  0x6a   : > { %p2883_p3 = pnand %p2881_p10, %p2867_p13  ;;  %p2889_p4 = scmp.lt.s32.totalorder %s2887_s11, %s2880_s19 }
  0x6c   : > { %p2884_p8 = pneg %p2883_p3  ;;  %p2890_p12 = por %p2889_p4, %p2888_p5 }
  0x6e   : > { %p2891_p0 = pnand %p2890_p12, %p2884_p8 }
  0x70   : > { %2894 = shalt.err (!%p2891_p0)
}
  0x71   : > { %s4534_s10 = smov 4   ;;  %s4535_s18 = smov 64  }
  0x72   : > { %2643 = dma.hbm_to_vmem [thread:$0]  (!%p3382_p9), %s3374_s26, 128, %s3376_s5, %s3388_s30, %s4535_s18, %s4535_s18, %s4534_s10  }
  0x73   : > { %s4536_s7 = sld [smem:[#allocation38_spill]]  ;;  %p4537_p8 = pneg %p3288_p6 }
  0x79   : > { %s2895_s9 = scalar_lea.hbm %s4536_s7, 1024 }
  0x7a   : > { %p2896_p2 = scmp.ne.s32.totalorder %s4536_s7, %s2895_s9  ;;  %p2902_p7 = scmp.lt.u32.totalorder %s2895_s9, %s4536_s7 }
  0x7c   : > { %p2898_p11 = pnand %p2896_p2, %p4537_p8 }
  0x7e   : > { %p2899_p5 = pneg %p2898_p11 }
  0x80   : > { %p2904_p13 = pnand %p2902_p7, %p2899_p5 }
  0x82   : > { %2907 = shalt.err (!%p2904_p13)
}
  0x83   : > { %s2908_s5 = scalar_lea.vmem %s3386_s13, 1024  ;;  %p4538_p1 = pmov %p4537_p8 }
  0x84   : > { %p2909_p9 = scmp.ne.s32.totalorder %s3386_s13, %s2908_s5  ;;  %p2916_p4 = scmp.lt.s32.totalorder %s3386_s13, %s3386_s13 }
  0x85   : > { %p2917_p12 = scmp.lt.s32.totalorder %s2908_s5, %s2908_s5 }
  0x86   : > { %p2911_p10 = pnand %p2909_p9, %p4538_p1 }
  0x87   : > { %p2918_p0 = por %p2917_p12, %p2916_p4 }
  0x88   : > { %p2912_p3 = pneg %p2911_p10 }
  0x8a   : > { %p2919_p2 = pnand %p2918_p0, %p2912_p3 }
  0x8c   : > { %2922 = shalt.err (!%p2919_p2)
}
  0x8d   : > { %2636 = dma.hbm_to_vmem [thread:$0]  (!%p3288_p6), %s4536_s7, 1024, %s3386_s13, [#allocation10], %s4535_s18, %s4535_s18, %s4534_s10  }
  0x8e   : > { %s2421_s27 = sadd.s32 4294967294, %s3141_s22   ;;  %s50_s6 = sadd.s32 1, %s3121_s17 }
  0x8f   : > { %p57_p8 = scmp.ne.s32.totalorder %s3121_s17, %s3117_s16  ;;  %p4539_p11 = scmp.eq.s32.totalorder %s3337_s8, 0 }
  0x90   : > { %p4540_p5 = scmp.eq.s32.totalorder %s3141_s22, 0  ;;  %p63_p13 = scmp.ne.s32.totalorder %s3117_s16, %s3113_s15 }
  0x91   : > { %s3454_s29 = scalar_select %p4539_p11, %s3121_s17, %s50_s6  }
  0x92   : > { %p3458_p7 = por %p4540_p5, %p57_p8  ;;  %p4542_p9 = scmp.eq.s32.totalorder %s3274_s23, 7 }
  0x93   : > { %p293_p6 = scmp.eq.s32.totalorder %s2421_s27, 7  ;;  %p4544_p10 = scmp.eq.s32.totalorder %s3274_s23, 0 }
  0x94   : > { %p3466_p1 = por %p4542_p9, %p57_p8  ;;  %s351_s8 = sand.u32 1, %s3121_s17  }
  0x95   : > { %p3472_p3 = por %p4544_p10, %p63_p13  ;;  %p3477_p4 = por %p293_p6, %p63_p13 }
  0x96   : > { %s4543_s25 = scalar_select %p3466_p1, 1, 0 }
  0x97   : > { %s4546_s2 = scalar_select %p3477_p4, 1, 0 }
  0x98   : > { %s2432_s4 = sshll.u32 %s351_s8, 5  ;;  %s2522_s19 = sshll.u32 %s3133_s20, 3 }
  0x99   : > { %s362_s5 = sadd.s32 %s2522_s19, %s3366_s28  ;;  %s355_s11 = scalar_lea.vmem [#allocation3], %s2432_s4 }
  0x9a   : > { %s2436_s26 = sshll.u32 %s362_s5, 6  ;;  %s365_s6 = sshll.u32 %s355_s11, 4  ;;  %s3488_s6 = int_to_ptr.vmem [resolvable:$true] %s365_s6 }
  0x9b   : > { %s4547_s0 = sld [smem:[#allocation31_spill]]  ;;  %p4548_p12 = scmp.lt.s32.totalorder %s3141_s22, 8 }
  0x9c   : > { %s3498_s4 = scalar_lea.sflag [#allocation4], %s351_s8 }
  0x9d   : > { %p3494_p0 = pnand %p4548_p12, %p3458_p7 }
  0x9f   : > { %p2925_p8 = pneg %p3494_p0 }
  0xa1   : > { %s3486_s27 = scalar_lea.hbm %s4547_s0, %s2436_s26  ;;  %s2928_s9 = scalar_lea.hbm %s4547_s0, 4096 }
  0xa2   : > { %s2923_s19 = scalar_lea.hbm %s3486_s27, 512  ;;  %p2929_p7 = scmp.lt.u32.totalorder %s3486_s27, %s4547_s0 }
  0xa3   : > { %p2924_p2 = scmp.ne.s32.totalorder %s3486_s27, %s2923_s19  ;;  %p2930_p13 = scmp.lt.u32.totalorder %s2928_s9, %s2923_s19 }
  0xa4   : > { %p2932_p6 = scmp.lt.u32.totalorder %s2923_s19, %s3486_s27 }
  0xa5   : > { %p2926_p11 = pnand %p2925_p8, %p2924_p2  ;;  %p2931_p9 = por %p2930_p13, %p2929_p7 }
  0xa7   : > { %p2927_p5 = pneg %p2926_p11  ;;  %p2933_p10 = por %p2932_p6, %p2931_p9 }
  0xa9   : > { %p2934_p12 = pnand %p2933_p10, %p2927_p5 }
  0xab   : > { %2937 = shalt.err (!%p2934_p12)
}
  0xac   : > { %s2938_s8 = scalar_lea.vmem %s3488_s6, 512  ;;  %s3148_s11 = smov [#allocation3]  }
  0xad   : > { %p2939_p2 = scmp.ne.s32.totalorder %s3488_s6, %s2938_s8  ;;  %s2943_s1 = sshll.u32 %s3148_s11, 4  ;;  %s2944_s1 = int_to_ptr.vmem [resolvable:$false] %s2943_s1 }
  0xae   : > { %s2945_s7 = scalar_lea.vmem %s2944_s1, 1024  ;;  %p2946_p1 = scmp.lt.s32.totalorder %s3488_s6, %s2944_s1 }
  0xaf   : > { %p2941_p11 = pnand %p2939_p2, %p2925_p8  ;;  %p2947_p7 = scmp.lt.s32.totalorder %s2945_s7, %s2938_s8 }
  0xb1   : > { %p2942_p4 = pneg %p2941_p11  ;;  %p2948_p13 = por %p2947_p7, %p2946_p1 }
  0xb3   : > { %p2949_p9 = pnand %p2948_p13, %p2942_p4 }
  0xb5   : > { %2952 = shalt.err (!%p2949_p9)
}
  0xb6   : > { %s4550_s19 = sld [smem:[#allocation20_spill]]  ;;  %s4551_s9 = sld [smem:[#allocation19_spill]] }
  0xb7   : > { %s4552_s5 = sld [smem:[#allocation18_spill]]  ;;  %s4553_s26 = sld [smem:[#allocation29_spill]] }
  0xb8   : > { %2640 = dma.hbm_to_vmem [thread:$0]  (!%p3494_p0), %s3486_s27, 512, %s3488_s6, %s3498_s4, %s4535_s18, %s4535_s18, %s4534_s10  }
  0xb9   : > { %p4554_p1 = scmp.lt.s32.totalorder %s3348_s3, 15  ;;  %p4555_p4 = scmp.lt.s32.totalorder %s3358_s24, 15 }
  0xba   : > { %p4556_p6 = scmp.eq.s32.totalorder %s3141_s22, 0  ;;  %p4558_p2 = scmp.eq.s32.totalorder %s3274_s23, 0 }
  0xbb   : > { %s4634_s3 = smov (!%p4554_p1, %s3348_s3), 15  ;;  %s4636_s24 = smov (!%p4555_p4, %s3358_s24), 15 }
  0xbc   : > { %s122_s21 = sadd.s32 1, %s4550_s19  ;;  %p129_p8 = scmp.ne.s32.totalorder %s4550_s19, %s4551_s9 }
  0xbd   : > { %s118_s8 = ssub.s32 %s4634_s3, %s4636_s24  ;;  %p135_p5 = scmp.ne.s32.totalorder %s4551_s9, %s4552_s5 }
  0xbe   : > { %s119_s11 = sor.u32 %s118_s8, %s4553_s26  ;;  %p3543_p10 = por %p129_p8, %p4556_p6 }
  0xbf   : > { %p120_p12 = scmp.eq.s32.totalorder %s119_s11, 0  ;;  %p3549_p11 = por %p135_p5, %p4558_p2 }
  0xc0   : > { %s404_s27 = sand.u32 1, %s4550_s19   ;;  %s2445_s4 = sshll.u32 %s4634_s3, 1 }
  0xc1   : > { %s4559_s6 = scalar_select %p3549_p11, 1, 0 }
  0xc2   : > { %s4638_s19 = smov (!%p120_p12, %s4550_s19), %s122_s21  ;;  %s2443_s24 = sshll.u32 %s404_s27, 3 }
  0xc3   : > { %s416_s7 = sadd.s32 %s2445_s4, %s3366_s28  ;;  %s4560_s8 = sld [smem:[#allocation33_spill]] }
  0xc4   : > { %s2447_s9 = sshll.u32 %s416_s7, 6  ;;  %s406_s11 = scalar_lea.vmem [#allocation8], %s2443_s24 }
  0xc5   : > { %s419_s20 = sshll.u32 %s406_s11, 4  ;;  %p4561_p0 = scmp.lt.s32.totalorder %s3141_s22, 8  ;;  %s3563_s20 = int_to_ptr.vmem [resolvable:$true] %s419_s20 }
  0xc7   : > { %p3569_p7 = pnand %p4561_p0, %p3543_p10 }
  0xc9   : > { %s3561_s0 = scalar_lea.hbm %s4560_s8, %s2447_s9  ;;  %p2955_p9 = pneg %p3569_p7 }
  0xca   : > { %s2953_s28 = scalar_lea.hbm %s3561_s0, 128  ;;  %s2958_s4 = scalar_lea.hbm %s4560_s8, 4096 }
  0xcb   : > { %p2954_p13 = scmp.ne.s32.totalorder %s3561_s0, %s2953_s28  ;;  %p2959_p8 = scmp.lt.u32.totalorder %s3561_s0, %s4560_s8 }
  0xcc   : > { %p2960_p5 = scmp.lt.u32.totalorder %s2958_s4, %s2953_s28  ;;  %p2962_p10 = scmp.lt.u32.totalorder %s2953_s28, %s3561_s0 }
  0xcd   : > { %p2956_p1 = pnand %p2955_p9, %p2954_p13 }
  0xce   : > { %p2961_p6 = por %p2960_p5, %p2959_p8 }
  0xcf   : > { %p2957_p4 = pneg %p2956_p1 }
  0xd0   : > { %p2963_p12 = por %p2962_p10, %p2961_p6 }
  0xd2   : > { %p2964_p2 = pnand %p2963_p12, %p2957_p4 }
  0xd4   : > { %2967 = shalt.err (!%p2964_p2)
}
  0xd5   : > { %s2968_s7 = scalar_lea.vmem %s3563_s20, 128  ;;  %s3149_s9 = smov [#allocation8]  }
  0xd6   : > { %p2969_p0 = scmp.ne.s32.totalorder %s3563_s20, %s2968_s7  ;;  %s2973_s5 = sshll.u32 %s3149_s9, 4  ;;  %s2974_s5 = int_to_ptr.vmem [resolvable:$false] %s2973_s5 }
  0xd7   : > { %s2975_s26 = scalar_lea.vmem %s2974_s5, 256  ;;  %p2976_p11 = scmp.lt.s32.totalorder %s3563_s20, %s2974_s5 }
  0xd8   : > { %p2971_p13 = pnand %p2969_p0, %p2955_p9  ;;  %p2977_p8 = scmp.lt.s32.totalorder %s2975_s26, %s2968_s7 }
  0xda   : > { %p2972_p1 = pneg %p2971_p13  ;;  %p2978_p5 = por %p2977_p8, %p2976_p11 }
  0xdc   : > { %p2979_p6 = pnand %p2978_p5, %p2972_p1 }
  0xde   : > { %2982 = shalt.err (!%p2979_p6)
}
  0xdf   : > { %2646 = dma.hbm_to_vmem [thread:$0]  (!%p3569_p7), %s3561_s0, 128, %s3563_s20, %s3388_s30, %s4535_s18, %s4535_s18, %s4534_s10  }
  0xe0   : > { %s4563_s11 = sld [smem:[#allocation26_spill]] }
  0xe6   : > { %p4564_p9 = scmp.ne.s32.totalorder %s4563_s11, 0 }
  0xe7   : > { %s3605_s28 = sand.u32 (!%p4564_p9), 1, %s3117_s16  }
  0xe8   : > { %431 = sbr.rel (%p4564_p9) target bundleno = 981 (0x3d5), region = 56  ;;  %s2449_s21 = sshll.u32 (!%p4564_p9), %s3605_s28, 5 }
  0xe9   : > { %s434_s27 = scalar_lea.sflag (!%p4564_p9), [#allocation4], %s3605_s28  ;;  %s3609_s4 = scalar_lea.vmem (!%p4564_p9), [#allocation3], %s2449_s21 }
  0xef   : > { %3068 = dma.done.wait (%p3472_p3), %s434_s27, 512  }
  0xf0   : > { %3070 = vsyncadd (%p3472_p3), %s434_s27, 4294966784  ;;  %s4565_s0 = sld [smem:[#allocation21_spill]]  ;;  %s4566_s20 = sld [smem:[#allocation30_spill]] }
  0xf1   : > { %s442_s30 = sand.u32 1, %s3274_s23  }
  0xf2   : > { %s443_s3 = scalar_lea.sflag [#allocation7], %s442_s30 }
  0xf6   : > { %s444_s10 = sand.u32 1, %s4565_s0   ;;  %p4567_p11 = scmp.ne.s32.totalorder %s4566_s20, 0 }
  0xf7   : > { %s2450_s18 = sshll.u32 %s444_s10, 3 }
  0xf8   : > { %s446_s1 = scalar_lea.vmem [#allocation6], %s2450_s18 }
  0xf9   : > { %3072 = dma.done.wait (%p4567_p11), %s443_s3, 128  }
  0xfa   : > { %3074 = vsyncadd (%p4567_p11), %s443_s3, 4294967168  ;;  %s4568_s24 = sld [smem:[#allocation19_spill]]  ;;  %p4569_p3 = scmp.ne.s32.totalorder %s4559_s6, 0 }
 0x100   : > { %s453_s7 = sand.u32 1, %s4568_s24  }
 0x101   : > { %s3622_s9 = sshll.u32 %s453_s7, 3 }
 0x102   : > { %s455_s13 = scalar_lea.vmem [#allocation8], %s3622_s9 }
 0x103   : > { %3076 = dma.done.wait (%p4569_p3), %s443_s3, 128  }
 0x104   : > { %3078 = vsyncadd (%p4569_p3), %s443_s3, 4294967168  ;;  %p4570_p7 = scmp.eq.s32.totalorder %s3274_s23, 0 }
 0x106   : > { %3080 = dma.done.wait (%p4570_p7), [#allocation10], 2048   ;;  %p4571_p4 = pmov %p4570_p7 }
 0x107   : > { %v2775_v0 = vld [vmem:[#allocation9] sm:$0xff]   ;;  %v2776_v1 = vld [vmem:[#allocation9 + $0x8] sm:$0xff]   ;;  %v2777_v2 = vld [vmem:[#allocation9 + $0x10] sm:$0xff]   ;;  %vm878_vm0 = vsmask.f32 256  ;;  %vm877_vm1 = vcmask 1040384   ;;  %v1132_v48 = vlaneseq }
 0x108   : > { %3082 = vsyncadd (%p4571_p4), [#allocation10], 4294965248  ;;  %2562 = vmatprep.subr.bf16.mxu0 %v2775_v0  ;;  %v2778_v3 = vld [vmem:[#allocation9 + $0x18] sm:$0xff]   ;;  %v2783_v4 = vld [vmem:[%s446_s1] sm:$0xff]   ;;  %vm898_vm3 = vsmask.f32 7938 }
 0x109   : > { %2563 = vmatpush3.bf16.msra.mxu0 %v2775_v0  ;;  %2578 = vmatprep.mubr.bf16.mxu0 %v2783_v4  ;;  %v2779_v5 = vld [vmem:[#allocation9 + $0x20] sm:$0xff]   ;;  %v2780_v6 = vld [vmem:[#allocation9 + $0x28] sm:$0xff]   ;;  %v2781_v7 = vld [vmem:[#allocation9 + $0x30] sm:$0xff]   ;;  %s4576_s23 = sld [smem:[#allocation22_spill]]  ;;  %s4577_s26 = sld [smem:[#allocation36_spill]]  ;;  %v3682_v51 = vshrl.u32 %v1132_v48, 7 }
 0x10a   : > { %2564 = vmatprep.subr.bf16.mxu0 %v2776_v1  ;;  %v2782_v8 = vld [vmem:[#allocation9 + $0x38] sm:$0xff]   ;;  %v2784_v9 = vld [vmem:[%s3609_s4] sm:$0xff]   ;;  %v2785_v10 = vld [vmem:[%s3609_s4 + $0x8] sm:$0xff]   ;;  %s4578_s18 = sld [smem:[#allocation35_spill]]  ;;  %vm954_vm11 = vsmask.f32 4368 }
 0x10b   : > { %v2786_v11 = vld [vmem:[%s3609_s4 + $0x10] sm:$0xff]   ;;  %v2787_v12 = vld [vmem:[%s3609_s4 + $0x18] sm:$0xff]   ;;  %vm3641_vm2 = vmand %vm877_vm1, %vm878_vm0  ;;  %v3685_v55 = vsub.s32 0, %v3682_v51  ;;  %v1308_v61 = vsub.s32 1, %v3682_v51  ;;  %v1431_v0 = vsub.s32 2, %v3682_v51  ;;  %s4599_s6 = sld [smem:[#allocation37_spill]] }
 0x10c   : > { %v2788_v13 = vld [vmem:[%s455_s13] sm:$0xff]   ;;  %v883_v15 = vld [vmem:[#allocation2 + $0xc] sm:$0x1]  ;;  %vm3651_vm4 = vmand %vm877_vm1, %vm898_vm3  ;;  %s2454_s5 = sshll.u32 %s3605_s28, 6  ;;  %s4600_s27 = sld [smem:[#allocation39_spill]] }
 0x10d   : > { %2565 = vmatpush3.bf16.msra.mxu0 %v2776_v1  ;;  %v880_v16 = vld [vmem:[#allocation2] sm:$0x1]  ;;  %v884_v17 = vsel %vm3641_vm2, 0, %v883_v15  ;;  %v903_v20 = vld [vmem:[#allocation2 + $0x14] sm:$0x1]  ;;  %v2789_v40 = vld [vmem:[#allocation11] sm:$0xff]  }
 0x10e   : > { %2566 = vmatprep.subr.bf16.mxu0 %v2777_v2  ;;  %v881_v18 = vsel %vm3641_vm2, 0, %v880_v16  ;;  %885 = vst [vmem:[#allocation2 + $0xc] sm:$0x1] %v884_v17  ;;  %v900_v21 = vld [vmem:[#allocation2 + $0x8] sm:$0x1]  ;;  %v904_v22 = vsel %vm3651_vm4, 0, %v903_v20  ;;  %2590 = vmatprep.subr.bf16.mxu1 %v2789_v40 }
 0x10f   : > { %882 = vst [vmem:[#allocation2] sm:$0x1] %v881_v18  ;;  %v901_v23 = vsel %vm3651_vm4, 0, %v900_v21  ;;  %905 = vst [vmem:[#allocation2 + $0x14] sm:$0x1] %v904_v22  ;;  %v2790_v41 = vld [vmem:[#allocation11 + $0x8] sm:$0xff]   ;;  %2591 = vmatpush3.bf16.msra.mxu1 %v2789_v40 }
 0x110   : > { %902 = vst [vmem:[#allocation2 + $0x8] sm:$0x1] %v901_v23  ;;  %v889_v24 = vld [vmem:[#allocation2 + $0x24] sm:$0x1]  ;;  %v886_v25 = vld [vmem:[#allocation2 + $0x18] sm:$0x1]  ;;  %2592 = vmatprep.subr.bf16.mxu1 %v2790_v41 }
 0x111   : > { %2567 = vmatpush3.bf16.msra.mxu0 %v2777_v2  ;;  %v890_v26 = vsel %vm3641_vm2, 0, %v889_v24  ;;  %v887_v27 = vsel %vm3641_vm2, 0, %v886_v25  ;;  %v909_v28 = vld [vmem:[#allocation2 + $0x2c] sm:$0x1]  ;;  %v906_v29 = vld [vmem:[#allocation2 + $0x20] sm:$0x1] }
 0x112   : > { %2568 = vmatprep.subr.bf16.mxu0 %v2778_v3  ;;  %891 = vst [vmem:[#allocation2 + $0x24] sm:$0x1] %v890_v26  ;;  %888 = vst [vmem:[#allocation2 + $0x18] sm:$0x1] %v887_v27  ;;  %v910_v30 = vsel %vm3651_vm4, 0, %v909_v28  ;;  %v907_v31 = vsel %vm3651_vm4, 0, %v906_v29 }
 0x113   : > { %911 = vst [vmem:[#allocation2 + $0x2c] sm:$0x1] %v910_v30  ;;  %908 = vst [vmem:[#allocation2 + $0x20] sm:$0x1] %v907_v31  ;;  %v895_v32 = vld [vmem:[#allocation2 + $0x3c] sm:$0x1]  ;;  %2593 = vmatpush3.bf16.msra.mxu1 %v2790_v41 }
 0x114   : > { %v892_v33 = vld [vmem:[#allocation2 + $0x30] sm:$0x1]  ;;  %v896_v34 = vsel %vm3641_vm2, 0, %v895_v32  ;;  %v915_v36 = vld [vmem:[#allocation2 + $0x44] sm:$0x1]  ;;  %v2791_v42 = vld [vmem:[#allocation11 + $0x10] sm:$0xff]  }
 0x115   : > { %2569 = vmatpush3.bf16.msra.mxu0 %v2778_v3  ;;  %v893_v35 = vsel %vm3641_vm2, 0, %v892_v33  ;;  %897 = vst [vmem:[#allocation2 + $0x3c] sm:$0x1] %v896_v34  ;;  %v912_v37 = vld [vmem:[#allocation2 + $0x38] sm:$0x1]  ;;  %v916_v38 = vsel %vm3651_vm4, 0, %v915_v36  ;;  %2594 = vmatprep.subr.bf16.mxu1 %v2791_v42 }
 0x116   : > { %2570 = vmatprep.subr.bf16.mxu0 %v2779_v5  ;;  %894 = vst [vmem:[#allocation2 + $0x30] sm:$0x1] %v893_v35  ;;  %v913_v39 = vsel %vm3651_vm4, 0, %v912_v37  ;;  %917 = vst [vmem:[#allocation2 + $0x44] sm:$0x1] %v916_v38  ;;  %v2792_v43 = vld [vmem:[#allocation11 + $0x18] sm:$0xff]  }
 0x117   : > { %914 = vst [vmem:[#allocation2 + $0x38] sm:$0x1] %v913_v39  ;;  %2595 = vmatpush3.bf16.msra.mxu1 %v2791_v42  ;;  %v2793_v44 = vld [vmem:[#allocation11 + $0x20] sm:$0xff]   ;;  %v2794_v45 = vld [vmem:[#allocation11 + $0x28] sm:$0xff]   ;;  %v2795_v46 = vld [vmem:[#allocation11 + $0x30] sm:$0xff]   ;;  %s2455_s11 = sshll.u32 %s4576_s23, 2 }
 0x118   : > { %2596 = vmatprep.subr.bf16.mxu1 %v2792_v43  ;;  %v2796_v47 = vld [vmem:[#allocation11 + $0x38] sm:$0xff]   ;;  %s2471_s4 = sadd.s32 4294967295, %s2455_s11  ;;  %s507_s0 = scalar_lea.vmem [#allocation12], %s2454_s5 }
 0x119   : > { %2571 = vmatpush3.bf16.msra.mxu0 %v2779_v5  ;;  %v1128_v49 = vld [vmem:[%s4577_s26] sm:$0x1]  ;;  %v1302_v50 = vld [vmem:[%s4577_s26] sm:$0x2]  ;;  %v1425_v56 = vld [vmem:[%s4577_s26] sm:$0x4]  ;;  %v3690_v57 = vstv %s2471_s4 }
 0x11a   : > { %2572 = vmatprep.subr.bf16.mxu0 %v2780_v6  ;;  %v1160_v52 = vshrl.u32 %v1128_v49, 16  ;;  %v1394_v53 = vshrl.u32 %v1302_v50, 16  ;;  %v1130_v54 = vpack.i.b16 %v1128_v49, %v1128_v49  ;;  %v3695_v59 = vld [vmem:[%s4578_s18] ss:$0 sm:$0xff]  ;;  %v1304_v60 = vpack.i.b16 %v1302_v50, %v1302_v50  ;;  %v3722_v16 = vld [vmem:[%s4577_s26] sm:$0x8] }
 0x11b   : > { %2597 = vmatpush3.bf16.msra.mxu1 %v2792_v43  ;;  %v1427_v63 = vpack.i.b16 %v1425_v56, %v1425_v56  ;;  %v1565_v1 = vshrl.u32 %v1425_v56, 16  ;;  %v3700_v3 = vadd.s32 1, %v3690_v57  ;;  %v3735_v24 = vadd.s32 4, %v3690_v57  ;;  %v1824_v38 = vld [vmem:[%s4577_s26 + $0x4] sm:$0x1]  ;;  %s4601_s4 = sld [smem:[#allocation23_spill]] }
 0x11c   : > { %2598 = vmatprep.subr.bf16.mxu1 %v2793_v44  ;;  %v1161_v58 = vpack.i.b16 %v1160_v52, %v1160_v52  ;;  %v1395_v62 = vpack.i.b16 %v1394_v53, %v1394_v53  ;;  %v1135_v4 = vrot.slane %v1130_v54, %v3685_v55  ;;  %v1685_v29 = vshrl.u32 %v3722_v16, 16  ;;  %s2535_s20 = sshll.u32 %s4576_s23, 3  ;;  %s2262_s18 = sshll.u32 %s507_s0, 4  ;;  %s4383_s18 = int_to_ptr.vmem [resolvable:$true] %s2262_s18 }
 0x11d   : > { %2573 = vmatpush3.bf16.msra.mxu0 %v2780_v6  ;;  %v1432_v20 = vrot.slane %v1427_v63, %v1431_v0  ;;  %v1566_v21 = vpack.i.b16 %v1565_v1, %v1565_v1  ;;  %v1655_v42 = vpack.i.b16 %v3722_v16, %v3722_v16  ;;  %v1659_v43 = vsub.s32 3, %v3682_v51  ;;  %s4602_s24 = sld [smem:[#allocation40_spill]]  ;;  %s2246_s9 = scalar_lea.sflag [#allocation5], %s3605_s28 }
 0x11e   : > { %2574 = vmatprep.subr.bf16.mxu0 %v2781_v7  ;;  %v1400_v15 = vrot.slane %v1395_v62, %v1308_v61  ;;  %v3737_v25 = vcombine.low %v1135_v4, %v1135_v4  ;;  %v1686_v48 = vpack.i.b16 %v1685_v29, %v1685_v29  ;;  %v1826_v54 = vpack.i.b16 %v1824_v38, %v1824_v38  ;;  %s2983_s13 = scalar_lea.vmem %s4383_s18, 1024  ;;  %p4603_p12 = scmp.ne.s32.totalorder %s4543_s25, 0 }
 0x11f   : > { %2599 = vmatpush3.bf16.msra.mxu1 %v2793_v44  ;;  %v3753_v36 = vcombine.low %v1432_v20, %v1432_v20  ;;  %v1571_v37 = vrot.slane %v1566_v21, %v1431_v0  ;;  %vm836_vm5 = vcmp.ge.s32.totalorder %v3700_v3, 0  ;;  %vm842_vm6 = vcmp.lt.s32.totalorder %v3700_v3, 16  ;;  %p2984_p10 = scmp.ne.s32.totalorder %s4383_s18, %s2983_s13 }
 0x120   : > { %2600 = vmatprep.subr.bf16.mxu1 %v2794_v45  ;;  %v3750_v33 = vcombine.low %v1400_v15, %v1400_v15  ;;  %vm835_vm7 = vcmp.ge.s32.totalorder %v3690_v57, 0  ;;  %vm841_vm8 = vcmp.lt.s32.totalorder %v3690_v57, 16  ;;  %vm3839_vm12 = vmand %vm836_vm5, %vm842_vm6 }
 0x121   : > { %2575 = vmatpush3.bf16.msra.mxu0 %v2781_v7  ;;  %v3707_v7 = vadd.s32 3, %v3690_v57  ;;  %vm3851_vm15 = vmand %vm835_vm7, %vm841_vm8  ;;  %vm839_vm7 = vcmp.ge.s32.totalorder %v3735_v24, 0  ;;  %vm845_vm8 = vcmp.lt.s32.totalorder %v3735_v24, 16  ;;  %v1082_v24 = vld [vmem:[#allocation2 + $0x8] sm:$0x1]  ;;  %s2518_s30 = sshll.u32 %s4601_s4, 5  ;;  %p2985_p2 = pnand %p2984_p10, %p4603_p12 }
 0x122   : > { %2576 = vmatprep.subr.bf16.mxu0 %v2782_v8  ;;  %s2259_s10 = sadd.s32 %s2535_s20, %s2518_s30 }
 0x123   : > { %2601 = vmatpush3.bf16.msra.mxu1 %v2794_v45  ;;  %vm838_vm9 = vcmp.ge.s32.totalorder %v3707_v7, 0  ;;  %vm844_vm10 = vcmp.lt.s32.totalorder %v3707_v7, 16  ;;  %s2519_s3 = sshll.u32 %s2259_s10, 7  ;;  %p2986_p0 = pneg %p2985_p2 }
 0x124   : > { %2602 = vmatprep.subr.bf16.mxu1 %v2795_v46  ;;  %vm3875_vm4 = vmand %vm838_vm9, %vm844_vm10  ;;  %vm1076_vm10 = vcmask 1043456   ;;  %s4388_s7 = scalar_lea.hbm %s4602_s24, %s2519_s3 }
 0x125   : > { %2577 = vmatpush3.bf16.msra.mxu0 %v2782_v8  ;;  %v3710_v8 = vadd.s32 2, %v3690_v57  ;;  %vm3888_vm9 = vmor %vm878_vm0, %vm954_vm11 }
 0x127   : > { %2603 = vmatpush3.bf16.msra.mxu1 %v2795_v46  ;;  %vm837_vm13 = vcmp.ge.s32.totalorder %v3710_v8, 0  ;;  %vm843_vm14 = vcmp.lt.s32.totalorder %v3710_v8, 16 }
 0x128   : > { %2579 = vmatmul.mubr.bf16.vlgmr.msra.gmra.mrb[0].mxu0 %v2784_v9  ;;  %2604 = vmatprep.subr.bf16.mxu1 %v2796_v47  ;;  %v1166_v9 = vrot.slane %v1161_v58, %v3685_v55  ;;  %vm3904_vm0 = vmand %vm837_vm13, %vm843_vm14  ;;  %vm1339_vm14 = vcmask 1046532  }
 0x129   : > { %2582 = vmatprep.mubr.bf16.mxu0 %v2785_v10  ;;  %vm3948_vm13 = vmand %vm1076_vm10, %vm898_vm3  ;;  %vm1338_vm3 = vcmask 1042432  }
 0x12a   : > { %v3742_v28 = vcombine.low %v1166_v9, %v1166_v9 }
 0x12b   : > { %2605 = vmatpush3.bf16.msra.mxu1 %v2796_v47 }
 0x130   : > { %2583 = vmatmul.mubr.bf16.gmra.mrb[4].mxu0 %v2786_v11 }
 0x131   : > { %2586 = vmatprep.mubr.bf16.mxu0 %v2787_v12  ;;  %v3717_v12 = vadd.s32 5, %v3690_v57 }
 0x133   : > { %vm840_vm5 = vcmp.ge.s32.totalorder %v3717_v12, 0  ;;  %vm846_vm6 = vcmp.lt.s32.totalorder %v3717_v12, 16 }
 0x134   : > { %vm3931_vm11 = vmand %vm840_vm5, %vm846_vm6  ;;  %vm2068_vm6 = vcmask 1046528  }
 0x138   : > { %2587 = vmatmul.mubr.bf16.gmra.mrb[8].mxu0 %v2788_v13  ;;  %v1309_v13 = vrot.slane %v1304_v60, %v1308_v61 }
 0x13a   : > { %v3748_v32 = vcombine.low %v1309_v13, %v1309_v13 }
 0x1fb   : > { %v2580_v2 = vpop.f32.mrb[0].mxu0 }
 0x1fc   : > { %v3704_v5 = vadd.f32 %v2580_v2, %v3695_v59  ;;  %v673_v6 = vpop.f32.mrb[1].mxu0 }
 0x1fd   : > { %v3714_v10 = vadd.f32 %v3695_v59, %v673_v6  ;;  %v2581_v11 = vpop.f32.mrb[2].mxu0 }
 0x1fe   : > { %v722_v17 = vmul.f32 %v3704_v5, %v3704_v5  ;;  %v3727_v18 = vadd.f32 %v2581_v11, %v3695_v59  ;;  %v676_v19 = vpop.f32.mrb[3].mxu0 }
 0x1ff   : > { %v720_v22 = vmul.f32 %v3714_v10, %v3714_v10  ;;  %v3732_v23 = vadd.f32 %v3695_v59, %v676_v19 }
 0x200   : > { %v734_v26 = vmul.f32 %v722_v17, %v3704_v5  ;;  %v723_v27 = vmul.f32 %v3727_v18, %v3727_v18  ;;  %v3789_v17 = vcombine.low %v1571_v37, %v1571_v37 }
 0x201   : > { %v732_v30 = vmul.f32 %v720_v22, %v3714_v10  ;;  %v721_v31 = vmul.f32 %v3732_v23, %v3732_v23  ;;  %v1660_v22 = vrot.slane %v1655_v42, %v1659_v43 }
 0x202   : > { %v746_v34 = vmul.f32 0.044715, %v734_v26  ;;  %v735_v35 = vmul.f32 %v723_v27, %v3727_v18 }
 0x203   : > { %v744_v39 = vmul.f32 0.044715, %v732_v30  ;;  %v733_v40 = vmul.f32 %v721_v31, %v3732_v23  ;;  %v2584_v41 = vpop.f32.mrb[4].mxu0  ;;  %v1691_v31 = vrot.slane %v1686_v48, %v1659_v43 }
 0x204   : > { %v758_v44 = vadd.f32 %v746_v34, %v3704_v5  ;;  %v747_v45 = vmul.f32 0.044715, %v735_v35  ;;  %v3764_v46 = vadd.f32 %v2584_v41, %v3695_v59  ;;  %v689_v47 = vpop.f32.mrb[5].mxu0 }
 0x205   : > { %v756_v49 = vadd.f32 %v744_v39, %v3714_v10  ;;  %v745_v50 = vmul.f32 0.044715, %v733_v40  ;;  %v3768_v52 = vadd.f32 %v3695_v59, %v689_v47  ;;  %v2585_v53 = vpop.f32.mrb[6].mxu0  ;;  %v3805_v39 = vrot.slane %v1826_v54, %v3685_v55 }
 0x206   : > { %v770_v56 = vmul.f32 0.7978846, %v758_v44  ;;  %v759_v58 = vadd.f32 %v747_v45, %v3727_v18  ;;  %v726_v51 = vmul.f32 %v3764_v46, %v3764_v46  ;;  %v3774_v60 = vadd.f32 %v2585_v53, %v3695_v59  ;;  %v692_v61 = vpop.f32.mrb[7].mxu0 }
 0x207   : > { %v768_v62 = vmul.f32 0.7978846, %v756_v49  ;;  %v757_v63 = vadd.f32 %v745_v50, %v3732_v23  ;;  %v724_v0 = vmul.f32 %v3768_v52, %v3768_v52  ;;  %v3780_v1 = vadd.f32 %v3695_v59, %v692_v61 }
 0x208   : > { %2797 = vtanh.f32 %v770_v56  ;;  %v771_v2 = vmul.f32 0.7978846, %v759_v58  ;;  %v738_v4 = vmul.f32 %v726_v51, %v3764_v46  ;;  %v727_v6 = vmul.f32 %v3774_v60, %v3774_v60 }
 0x209   : > { %2799 = vtanh.f32 %v768_v62  ;;  %v769_v9 = vmul.f32 0.7978846, %v757_v63  ;;  %v736_v11 = vmul.f32 %v724_v0, %v3768_v52  ;;  %v725_v13 = vmul.f32 %v3780_v1, %v3780_v1 }
 0x20a   : > { %2801 = vtanh.f32 %v771_v2  ;;  %v750_v15 = vmul.f32 0.044715, %v738_v4  ;;  %v739_v16 = vmul.f32 %v727_v6, %v3774_v60  ;;  %v3828_v63 = vcombine.low %v1691_v31, %v1691_v31 }
 0x20b   : > { %2803 = vtanh.f32 %v769_v9  ;;  %v748_v19 = vmul.f32 0.044715, %v736_v11  ;;  %v737_v20 = vmul.f32 %v725_v13, %v3780_v1  ;;  %v2588_v21 = vpop.f32.mrb[8].mxu0 }
 0x20c   : > { %v762_v26 = vadd.f32 %v750_v15, %v3764_v46  ;;  %v751_v27 = vmul.f32 0.044715, %v739_v16  ;;  %v3798_v29 = vadd.f32 %v2588_v21, %v3695_v59  ;;  %v705_v30 = vpop.f32.mrb[9].mxu0 }
 0x20d   : > { %v760_v34 = vadd.f32 %v748_v19, %v3768_v52  ;;  %v749_v35 = vmul.f32 0.044715, %v737_v20  ;;  %v3802_v37 = vadd.f32 %v3695_v59, %v705_v30  ;;  %v2589_v38 = vpop.f32.mrb[10].mxu0 }
 0x20e   : > { %v774_v40 = vmul.f32 0.7978846, %v762_v26  ;;  %v763_v41 = vadd.f32 %v751_v27, %v3774_v60  ;;  %v730_v42 = vmul.f32 %v3798_v29, %v3798_v29  ;;  %v3811_v44 = vadd.f32 %v2589_v38, %v3695_v59  ;;  %v708_v43 = vpop.f32.mrb[11].mxu0 }
 0x20f   : > { %v772_v45 = vmul.f32 0.7978846, %v760_v34  ;;  %v761_v47 = vadd.f32 %v749_v35, %v3780_v1  ;;  %v728_v48 = vmul.f32 %v3802_v37, %v3802_v37  ;;  %v3817_v49 = vadd.f32 %v3695_v59, %v708_v43 }
 0x210   : > { %2805 = vtanh.f32 %v774_v40  ;;  %v775_v55 = vmul.f32 0.7978846, %v763_v41  ;;  %v742_v50 = vmul.f32 %v730_v42, %v3798_v29  ;;  %v731_v53 = vmul.f32 %v3811_v44, %v3811_v44 }
 0x211   : > { %2807 = vtanh.f32 %v772_v45  ;;  %v773_v54 = vmul.f32 0.7978846, %v761_v47  ;;  %v740_v56 = vmul.f32 %v728_v48, %v3802_v37  ;;  %v729_v58 = vmul.f32 %v3817_v49, %v3817_v49 }
 0x212   : > { %v2798_v51 = vpop.eup %2797  ;;  %v754_v61 = vmul.f32 0.044715, %v742_v50  ;;  %v743_v62 = vmul.f32 %v731_v53, %v3811_v44  ;;  %v3826_v59 = vcombine.low %v1660_v22, %v1660_v22  ;;  %2809 = vtanh.f32 %v775_v55 }
 0x213   : > { %v2800_v0 = vpop.eup %2799  ;;  %v794_v2 = vadd.f32 1.0, %v2798_v51  ;;  %v752_v4 = vmul.f32 0.044715, %v740_v56  ;;  %v741_v6 = vmul.f32 %v729_v58, %v3817_v49  ;;  %2811 = vtanh.f32 %v773_v54 }
 0x214   : > { %v2802_v9 = vpop.eup %2801  ;;  %v792_v11 = vadd.f32 1.0, %v2800_v0  ;;  %v766_v13 = vadd.f32 %v754_v61, %v3798_v29  ;;  %v755_v15 = vmul.f32 0.044715, %v743_v62  ;;  %v3867_v51 = vcombine.low %v3805_v39, %v3805_v39 }
 0x215   : > { %v2804_v16 = vpop.eup %2803  ;;  %v806_v19 = vmul.f32 0.5, %v794_v2  ;;  %v795_v20 = vadd.f32 1.0, %v2802_v9  ;;  %v764_v21 = vadd.f32 %v752_v4, %v3802_v37  ;;  %v753_v22 = vmul.f32 0.044715, %v741_v6 }
 0x216   : > { %v804_v27 = vmul.f32 0.5, %v792_v11  ;;  %v793_v30 = vadd.f32 1.0, %v2804_v16  ;;  %v778_v31 = vmul.f32 0.7978846, %v766_v13  ;;  %v767_v34 = vadd.f32 %v755_v15, %v3811_v44 }
 0x217   : > { %v818_v35 = vmul.f32 %v806_v19, %v3704_v5  ;;  %v807_v38 = vmul.f32 0.5, %v795_v20  ;;  %v776_v40 = vmul.f32 0.7978846, %v764_v21  ;;  %v765_v41 = vadd.f32 %v753_v22, %v3817_v49 }
 0x218   : > { %v816_v42 = vmul.f32 %v804_v27, %v3714_v10  ;;  %v805_v43 = vmul.f32 0.5, %v793_v30  ;;  %2813 = vtanh.f32 %v778_v31  ;;  %v779_v45 = vmul.f32 0.7978846, %v767_v34 }
 0x219   : > { %v867_v5 = vsel %vm3839_vm12, %v818_v35, 0.0  ;;  %v819_v47 = vmul.f32 %v807_v38, %v3727_v18  ;;  %2815 = vtanh.f32 %v776_v40  ;;  %v777_v57 = vmul.f32 0.7978846, %v765_v41 }
 0x21a   : > { %v2806_v48 = vpop.eup %2805  ;;  %v2525_v55 = vpack.c.bf16 %v867_v5, %v867_v5  ;;  %v865_v50 = vsel %vm3851_vm15, %v816_v42, 0.0  ;;  %v817_v53 = vmul.f32 %v805_v43, %v3732_v23  ;;  %2817 = vtanh.f32 %v779_v45 }
 0x21b   : > { %v2808_v54 = vpop.eup %2807  ;;  %v2523_v10 = vpack.c.bf16 %v865_v50, %v865_v50  ;;  %v868_v56 = vsel %vm3839_vm12, %v819_v47, 0.0  ;;  %v798_v58 = vadd.f32 1.0, %v2806_v48  ;;  %2819 = vtanh.f32 %v777_v57  ;;  %vm3941_vm12 = vmand %vm839_vm7, %vm845_vm8 }
 0x21c   : > { %v974_v18 = vshrl.u32 %v2525_v55, 16  ;;  %v2526_v61 = vpack.c.bf16 %v868_v56, %v868_v56  ;;  %v866_v62 = vsel %vm3851_vm15, %v817_v53, 0.0  ;;  %v2810_v0 = vpop.eup %2809  ;;  %v977_v2 = vshll.u32 %v2525_v55, 16 }
 0x21d   : > { %v957_v23 = vshrl.u32 %v2523_v10, 16  ;;  %v2524_v4 = vpack.c.bf16 %v866_v62, %v866_v62  ;;  %v810_v6 = vmul.f32 0.5, %v798_v58  ;;  %v2812_v9 = vpop.eup %2811  ;;  %v960_v13 = vshll.u32 %v2523_v10, 16 }
 0x21e   : > { %v976_v11 = vrot.slane %v974_v18, 7  ;;  %v982_v15 = vshrl.u32 %v2526_v61, 16  ;;  %v796_v16 = vadd.f32 1.0, %v2808_v54  ;;  %v985_v20 = vshll.u32 %v2526_v61, 16 }
 0x21f   : > { %v959_v19 = vrot.slane %v957_v23, 7  ;;  %v965_v21 = vshrl.u32 %v2524_v4, 16  ;;  %v822_v22 = vmul.f32 %v810_v6, %v3764_v46  ;;  %v968_v30 = vshll.u32 %v2524_v4, 16 }
 0x220   : > { %v3884_v26 = vor.u32 %v977_v2, %v976_v11  ;;  %v3892_v27 = vrot.slane %v982_v15, 7  ;;  %v808_v31 = vmul.f32 0.5, %v796_v16  ;;  %v980_v34 = vrot.slane %v976_v11, 4 }
 0x221   : > { %v3894_v35 = vor.u32 %v960_v13, %v959_v19  ;;  %v3896_v46 = vrot.slane %v965_v21, 7  ;;  %v871_v3 = vsel %vm3875_vm4, %v822_v22, 0.0  ;;  %v963_v41 = vrot.slane %v959_v19, 4 }
 0x222   : > { %v2814_v40 = vpop.eup %2813  ;;  %v987_v42 = vor.u32 %v985_v20, %v3892_v27  ;;  %v2529_v43 = vpack.c.bf16 %v871_v3, %v871_v3  ;;  %v820_v45 = vmul.f32 %v808_v31, %v3768_v52  ;;  %v989_v47 = vrot.slane %v3892_v27, 4 }
 0x223   : > { %v2816_v5 = vpop.eup %2815  ;;  %v970_v57 = vor.u32 %v968_v30, %v3896_v46  ;;  %v799_v48 = vadd.f32 1.0, %v2810_v0  ;;  %v797_v55 = vadd.f32 1.0, %v2812_v9  ;;  %v802_v0 = vadd.f32 1.0, %v2814_v40 }
 0x224   : > { %v2818_v8 = vpop.eup %2817  ;;  %v988_v50 = vsel %vm3888_vm9, %v980_v34, %v987_v42  ;;  %v1008_v53 = vshrl.u32 %v2529_v43, 16  ;;  %v1011_v54 = vshll.u32 %v2529_v43, 16  ;;  %v869_v10 = vsel %vm3904_vm0, %v820_v45, 0.0 }
 0x225   : > { %1088 = vst [vmem:[#allocation2 + $0x10] sm:$0xf] %v988_v50  ;;  %v971_v52 = vsel %vm3888_vm9, %v963_v41, %v970_v57  ;;  %v2527_v56 = vpack.c.bf16 %v869_v10, %v869_v10  ;;  %v811_v58 = vmul.f32 0.5, %v799_v48  ;;  %v809_v18 = vmul.f32 0.5, %v797_v55  ;;  %v2820_v61 = vpop.eup %2819  ;;  %v1078_v41 = vld [vmem:[#allocation2] sm:$0xf] }
 0x226   : > { %1081 = vst [vmem:[#allocation2 + $0x4] sm:$0xf] %v971_v52  ;;  %v1010_v62 = vrot.slane %v1008_v53, 7  ;;  %v800_v2 = vadd.f32 1.0, %v2816_v5  ;;  %v803_v23 = vadd.f32 1.0, %v2818_v8  ;;  %v972_v4 = vrot.slane %v3896_v46, 4 }
 0x227   : > { %v991_v6 = vshrl.u32 %v2527_v56, 16  ;;  %v823_v9 = vmul.f32 %v811_v58, %v3774_v60  ;;  %v821_v11 = vmul.f32 %v809_v18, %v3780_v1  ;;  %v994_v15 = vshll.u32 %v2527_v56, 16  ;;  %v1103_v60 = vld [vmem:[#allocation2 + $0x2c] sm:$0x1] }
 0x228   : > { %v3921_v13 = vor.u32 %v1011_v54, %v1010_v62  ;;  %v814_v16 = vmul.f32 0.5, %v802_v0  ;;  %v812_v19 = vmul.f32 0.5, %v800_v2  ;;  %v815_v1 = vmul.f32 0.5, %v803_v23  ;;  %v1085_v0 = vld [vmem:[#allocation2 + $0xc] sm:$0xf] }
 0x229   : > { %v993_v20 = vrot.slane %v991_v6, 7  ;;  %v872_v21 = vsel %vm3875_vm4, %v823_v9, 0.0  ;;  %v870_v22 = vsel %vm3904_vm0, %v821_v11, 0.0  ;;  %v1014_v12 = vrot.slane %v1010_v62, 4  ;;  %v1089_v2 = vld [vmem:[#allocation2 + $0x14] sm:$0x1] }
 0x22a   : > { %v2530_v30 = vpack.c.bf16 %v872_v21, %v872_v21  ;;  %v2528_v31 = vpack.c.bf16 %v870_v22, %v870_v22  ;;  %v826_v34 = vmul.f32 %v814_v16, %v3798_v29  ;;  %v824_v46 = vmul.f32 %v812_v19, %v3802_v37  ;;  %v1092_v11 = vld [vmem:[#allocation2 + $0x18] sm:$0xf] }
 0x22b   : > { %v996_v3 = vor.u32 %v994_v15, %v993_v20  ;;  %v827_v38 = vmul.f32 %v815_v1, %v3811_v44  ;;  %v801_v40 = vadd.f32 1.0, %v2820_v61  ;;  %v1079_v52 = vsel %vm3948_vm13, %v3894_v35, %v1078_v41  ;;  %v1117_v41 = vld [vmem:[#allocation2 + $0x44] sm:$0x1] }
 0x22c   : > { %v1016_v42 = vshrl.u32 %v2530_v30, 16  ;;  %v1019_v43 = vshll.u32 %v2530_v30, 16  ;;  %v999_v45 = vshrl.u32 %v2528_v31, 16  ;;  %v1002_v29 = vshll.u32 %v2528_v31, 16  ;;  %1080 = vst [vmem:[#allocation2] sm:$0xf] %v1079_v52 }
 0x22d   : > { %v875_v5 = vsel %vm3931_vm11, %v826_v34, 0.0  ;;  %v873_v57 = vsel %vm3941_vm12, %v824_v46, 0.0  ;;  %v876_v44 = vsel %vm3931_vm11, %v827_v38, 0.0  ;;  %v813_v48 = vmul.f32 0.5, %v801_v40  ;;  %v1096_v46 = vld [vmem:[#allocation2 + $0x20] sm:$0x1] }
 0x22e   : > { %v1018_v55 = vrot.slane %v1016_v42, 7  ;;  %v1001_v8 = vrot.slane %v999_v45, 7  ;;  %v2533_v50 = vpack.c.bf16 %v875_v5, %v875_v5  ;;  %v3958_v53 = vpack.c.bf16 %v873_v57, %v873_v57  ;;  %v1121_v39 = vld [vmem:[#allocation2 + $0x4] sm:$0xf] }
 0x22f   : > { %v2534_v54 = vpack.c.bf16 %v876_v44, %v876_v44  ;;  %v825_v10 = vmul.f32 %v813_v48, %v3817_v49  ;;  %v1083_v56 = vsel %vm3641_vm2, %v972_v4, %v1082_v24  ;;  %v997_v58 = vrot.slane %v993_v20, 4 }
 0x230   : > { %v1021_v18 = vor.u32 %v1019_v43, %v1018_v55  ;;  %v1023_v61 = vrot.slane %v1018_v55, 4  ;;  %v1004_v62 = vor.u32 %v1002_v29, %v1001_v8  ;;  %1084 = vst [vmem:[#allocation2 + $0x8] sm:$0x1] %v1083_v56  ;;  %v1006_v23 = vrot.slane %v1001_v8, 4 }
 0x231   : > { %v1042_v6 = vshrl.u32 %v2533_v50, 16  ;;  %v1045_v9 = vshll.u32 %v2533_v50, 16  ;;  %v1025_v49 = vshrl.u32 %v3958_v53, 16  ;;  %v1050_v15 = vshrl.u32 %v2534_v54, 16  ;;  %v1110_v50 = vld [vmem:[#allocation2 + $0x38] sm:$0x1] }
 0x232   : > { %v1022_v35 = vsel %vm3888_vm9, %v1014_v12, %v1021_v18  ;;  %v1005_v4 = vsel %vm3888_vm9, %v997_v58, %v1004_v62  ;;  %v1053_v16 = vshll.u32 %v2534_v54, 16  ;;  %v874_v21 = vsel %vm3941_vm12, %v825_v10, 0.0 }
 0x233   : > { %1102 = vst [vmem:[#allocation2 + $0x28] sm:$0xf] %v1022_v35  ;;  %1095 = vst [vmem:[#allocation2 + $0x1c] sm:$0xf] %v1005_v4  ;;  %v1044_v19 = vrot.slane %v1042_v6, 7  ;;  %v3971_v20 = vrot.slane %v1025_v49, 7  ;;  %v1086_v22 = vsel %vm3948_vm13, %v3884_v26, %v1085_v0  ;;  %v2532_v30 = vpack.c.bf16 %v874_v21, %v874_v21 }
 0x234   : > { %v1052_v1 = vrot.slane %v1050_v15, 7  ;;  %1087 = vst [vmem:[#allocation2 + $0xc] sm:$0xf] %v1086_v22  ;;  %v1090_v31 = vsel %vm3641_vm2, %v989_v47, %v1089_v2  ;;  %v1093_v34 = vsel %vm3948_vm13, %v996_v3, %v1092_v11  ;;  %v1028_v26 = vshll.u32 %v3958_v53, 16  ;;  %v1120_v29 = vld [vmem:[#allocation2] sm:$0xf] }
 0x235   : > { %v3984_v12 = vor.u32 %v1045_v9, %v1044_v19  ;;  %v1048_v38 = vrot.slane %v1044_v19, 4  ;;  %v1031_v40 = vrot.slane %v3971_v20, 4  ;;  %1091 = vst [vmem:[#allocation2 + $0x14] sm:$0x1] %v1090_v31  ;;  %1094 = vst [vmem:[#allocation2 + $0x18] sm:$0xf] %v1093_v34  ;;  %v1097_v3 = vsel %vm3641_vm2, %v1006_v23, %v1096_v46 }
 0x236   : > { %vm1183_vm15 = vsmask.f32 3328  ;;  %vm1184_vm4 = vsmask.f32 7440  ;;  %v1055_v27 = vor.u32 %v1053_v16, %v1052_v1  ;;  %v1057_v42 = vrot.slane %v1052_v1, 4 }
 0x237   : > { %v1033_v47 = vshrl.u32 %v2532_v30, 16  ;;  %v1036_v43 = vshll.u32 %v2532_v30, 16  ;;  %v1104_v45 = vsel %vm3641_vm2, %v1023_v61, %v1103_v60  ;;  %v1141_v24 = vmul.bf16 %v3737_v25, %v1121_v39  ;;  %v1156_v5 = vld [vmem:[#allocation2 + $0x8] sm:$0x1]  ;;  %1098 = vst [vmem:[#allocation2 + $0x20] sm:$0x1] %v1097_v3  ;;  %vm4028_vm5 = vmor %vm1183_vm15, %vm1184_vm4 }
 0x238   : > { %v1172_v57 = vmul.bf16 %v3742_v28, %v1121_v39  ;;  %v1056_v44 = vsel %vm3888_vm9, %v1048_v38, %v1055_v27  ;;  %1105 = vst [vmem:[#allocation2 + $0x2c] sm:$0x1] %v1104_v45  ;;  %v1118_v55 = vsel %vm3641_vm2, %v1057_v42, %v1117_v41  ;;  %v1140_v8 = vmul.bf16 %v3737_v25, %v1120_v29  ;;  %v1298_v58 = vld [vmem:[#allocation2] sm:$0xe]  ;;  %v4008_v16 = vld [vmem:[#allocation2 + $0x10] sm:$0xf] }
 0x239   : > { %v1035_v48 = vrot.slane %v1033_v47, 7  ;;  %1116 = vst [vmem:[#allocation2 + $0x40] sm:$0xf] %v1056_v44  ;;  %1119 = vst [vmem:[#allocation2 + $0x44] sm:$0x1] %v1118_v55  ;;  %v1149_v54 = vadd.bf16 0, %v1141_v24  ;;  %v1171_v10 = vmul.bf16 %v3742_v28, %v1120_v29  ;;  %v1173_v52 = vmul.bf16 %v3742_v28, %v1156_v5 }
 0x23a   : > { %v1196_v56 = vshll.u32 %v1172_v57, 16  ;;  %v1148_v62 = vadd.bf16 0, %v1140_v8  ;;  %v1200_v0 = vshrl.u32 %v1172_v57, 16  ;;  %v1314_v15 = vmul.bf16 %v3748_v32, %v1298_v58 }
 0x23b   : > { %v1038_v18 = vor.u32 %v1036_v43, %v1035_v48  ;;  %v1040_v61 = vrot.slane %v1035_v48, 4  ;;  %v1187_v2 = vshrl.u32 %v1171_v10, 16  ;;  %v1190_v23 = vshll.u32 %v1171_v10, 16  ;;  %v4001_v49 = vld [vmem:[#allocation2 + $0xc] sm:$0xf] }
 0x23c   : > { %v1198_v6 = vrot.slane %v1196_v56, 5  ;;  %v1206_v9 = vshll.u32 %v1173_v52, 16  ;;  %v1202_v4 = vrot.slane %v1200_v0, 4  ;;  %v1315_v60 = vmul.bf16 %v3748_v32, %v1121_v39  ;;  %v4011_v1 = vld [vmem:[#allocation2 + $0x14] sm:$0x1] }
 0x23d   : > { %v1039_v11 = vsel %vm3888_vm9, %v1031_v40, %v1038_v18  ;;  %v1111_v35 = vsel %vm3641_vm2, %v1040_v61, %v1110_v50  ;;  %v1189_v19 = vrot.slane %v1187_v2, 4  ;;  %v1192_v21 = vrot.slane %v1190_v23, 5  ;;  %vm4016_vm2 = vmor %vm1338_vm3, %vm1339_vm14  ;;  %v1561_v55 = vld [vmem:[#allocation2 + $0xc] sm:$0xe] }
 0x23e   : > { %1109 = vst [vmem:[#allocation2 + $0x34] sm:$0xf] %v1039_v11  ;;  %1112 = vst [vmem:[#allocation2 + $0x38] sm:$0x1] %v1111_v35  ;;  %v1208_v22 = vrot.slane %v1206_v9, 5  ;;  %v1203_v30 = vor.u32 %v1202_v4, %v1198_v6  ;;  %v1316_v7 = vmul.bf16 %v3748_v32, %v1156_v5  ;;  %v2487_v31 = vrot.slane %v1314_v15, 9 }
 0x23f   : > { %v1405_v34 = vmul.bf16 %v3750_v33, %v4001_v49  ;;  %v1193_v46 = vor.u32 %v1192_v21, %v1189_v19  ;;  %v1343_v38 = vrot.slane %v1315_v60, 5  ;;  %v1406_v39 = vmul.bf16 %v3750_v33, %v4008_v16  ;;  %v1646_v15 = vld [vmem:[#allocation2 + $0x1c] sm:$0xf] }
 0x240   : > { %v1437_v40 = vmul.bf16 %v3753_v36, %v4001_v49  ;;  %v1204_v27 = vrot.slane %v1203_v30, 4  ;;  %v1346_v42 = vrot.slane %v1316_v7, 5  ;;  %v1438_v47 = vmul.bf16 %v3753_v36, %v4008_v16 }
 0x241   : > { %v1439_v43 = vmul.bf16 %v3753_v36, %v4011_v1  ;;  %v1194_v3 = vrot.slane %v1193_v46, 4  ;;  %v1344_v45 = vsel %vm4016_vm2, %v2487_v31, %v1343_v38  ;;  %v1345_v29 = vrot.slane %v1343_v38, 4  ;;  %v1681_v46 = vld [vmem:[#allocation2 + $0x20] sm:$0x1] }
 0x242   : > { %v1450_v24 = vshrl.u32 %v1437_v40, 16  ;;  %v1209_v5 = vsel %vm4028_vm5, %v1204_v27, %v1208_v22  ;;  %v1453_v57 = vshll.u32 %v1437_v40, 16  ;;  %v1459_v44 = vshll.u32 %v1438_v47, 16 }
 0x243   : > { %v1463_v48 = vshrl.u32 %v1438_v47, 16  ;;  %v1199_v8 = vsel %vm4028_vm5, %v1194_v3, %v1198_v6  ;;  %v1291_v50 = vadd.bf16 %v1209_v5, %v1149_v54  ;;  %v1347_v10 = vsel %vm4016_vm2, %v1345_v29, %v1346_v42  ;;  %v1645_v6 = vld [vmem:[#allocation2 + $0x18] sm:$0xf] }
 0x244   : > { %v1452_v52 = vrot.slane %v1450_v24, 4  ;;  %v1290_v56 = vadd.bf16 %v1199_v8, %v1148_v62  ;;  %v1455_v58 = vrot.slane %v1453_v57, 5  ;;  %v1461_v18 = vrot.slane %v1459_v44, 5  ;;  %v1820_v3 = vld [vmem:[#allocation2 + $0x18] sm:$0xe] }
 0x245   : > { %v1465_v61 = vrot.slane %v1463_v48, 4  ;;  %v1378_v0 = vadd.bf16 %v1347_v10, %v1291_v50  ;;  %v1469_v2 = vshll.u32 %v1439_v43, 16  ;;  %v1576_v23 = vmul.bf16 %v3789_v17, %v1561_v55 }
 0x246   : > { %v1577_v9 = vmul.bf16 %v3789_v17, %v4008_v16  ;;  %v1377_v11 = vadd.bf16 %v1344_v45, %v1290_v56  ;;  %v1456_v35 = vor.u32 %v1455_v58, %v1452_v52  ;;  %v1578_v54 = vmul.bf16 %v3789_v17, %v4011_v1 }
 0x247   : > { %v1466_v4 = vor.u32 %v1465_v61, %v1461_v18  ;;  %v1414_v19 = vadd.bf16 %v1406_v39, %v1378_v0  ;;  %v1471_v62 = vrot.slane %v1469_v2, 5  ;;  %v2494_v21 = vrot.slane %v1576_v23, 9 }
 0x248   : > { %v1602_v22 = vrot.slane %v1577_v9, 5  ;;  %v1413_v60 = vadd.bf16 %v1405_v34, %v1377_v11  ;;  %v1457_v30 = vrot.slane %v1456_v35, 4  ;;  %v1605_v31 = vrot.slane %v1578_v54, 5  ;;  %v1099_v11 = vld [vmem:[#allocation2 + $0x24] sm:$0xf] }
 0x249   : > { %v1467_v7 = vrot.slane %v1466_v4, 4  ;;  %v1665_v27 = vmul.bf16 %v3826_v59, %v1645_v6  ;;  %v1666_v42 = vmul.bf16 %v3826_v59, %v1646_v15  ;;  %v1696_v34 = vmul.bf16 %v3828_v63, %v1645_v6 }
 0x24a   : > { %v1603_v38 = vsel %vm4016_vm2, %v2494_v21, %v1602_v22  ;;  %v1604_v40 = vrot.slane %v1602_v22, 4  ;;  %v1462_v47 = vsel %vm4028_vm5, %v1457_v30, %v1461_v18  ;;  %v1697_v43 = vmul.bf16 %v3828_v63, %v1646_v15 }
 0x24b   : > { %v1472_v39 = vsel %vm4028_vm5, %v1467_v7, %v1471_v62  ;;  %v1553_v45 = vadd.bf16 %v1462_v47, %v1413_v60  ;;  %v1698_v5 = vmul.bf16 %v3828_v63, %v1681_v46  ;;  %v1709_v57 = vshrl.u32 %v1696_v34, 16  ;;  %v1123_v62 = vld [vmem:[#allocation2 + $0x10] sm:$0xf] }
 0x24c   : > { %v1554_v29 = vadd.bf16 %v1472_v39, %v1414_v19  ;;  %v1606_v24 = vsel %vm4016_vm2, %v1604_v40, %v1605_v31  ;;  %v1712_v44 = vshll.u32 %v1696_v34, 16  ;;  %v1718_v48 = vshll.u32 %v1697_v43, 16  ;;  %v1122_v19 = vld [vmem:[#allocation2 + $0xc] sm:$0xf]  ;;  %v1157_v40 = vld [vmem:[#allocation2 + $0x14] sm:$0x1] }
 0x24d   : > { %v1722_v55 = vshrl.u32 %v1697_v43, 16  ;;  %v1636_v8 = vadd.bf16 %v1603_v38, %v1553_v45  ;;  %v1728_v10 = vshll.u32 %v1698_v5, 16  ;;  %v1836_v52 = vmul.bf16 %v3867_v51, %v1820_v3  ;;  %v1299_v45 = vld [vmem:[#allocation2 + $0xc] sm:$0xe] }
 0x24e   : > { %v1637_v50 = vadd.bf16 %v1606_v24, %v1554_v29  ;;  %v1711_v56 = vrot.slane %v1709_v57, 4  ;;  %v1714_v58 = vrot.slane %v1712_v44, 5  ;;  %v1720_v18 = vrot.slane %v1718_v48, 5 }
 0x24f   : > { %v1724_v61 = vrot.slane %v1722_v55, 4  ;;  %v4066_v0 = vor.u32 %v1028_v26, %v3971_v20  ;;  %v1673_v2 = vadd.bf16 %v1665_v27, %v1636_v8  ;;  %v1837_v9 = vmul.bf16 %v3867_v51, %v1646_v15 }
 0x250   : > { %v1674_v23 = vadd.bf16 %v1666_v42, %v1637_v50  ;;  %v1715_v35 = vor.u32 %v1714_v58, %v1711_v56  ;;  %v1730_v54 = vrot.slane %v1728_v10, 5  ;;  %v1838_v6 = vmul.bf16 %v3867_v51, %v1681_v46  ;;  %v4091_v50 = vld [vmem:[%s4599_s6] ss:$0 sm:$0xff]  ;;  %s3150_s6 = smov [#allocation12]  }
 0x251   : > { %v1725_v4 = vor.u32 %v1724_v61, %v1720_v18  ;;  %v2501_v21 = vrot.slane %v1836_v52, 9  ;;  %v1862_v22 = vrot.slane %v1837_v9, 5  ;;  %v1927_v60 = vunpack.c.l.bf16 %v4001_v49  ;;  %v4094_v9 = vld [vmem:[#allocation2 + $0x18] sm:$0xf]  ;;  %s2987_s5 = sshll.u32 %s3150_s6, 4  ;;  %s2988_s5 = int_to_ptr.vmem [resolvable:$false] %s2987_s5 }
 0x252   : > { %v1928_v53 = vunpack.c.l.bf16 %v4008_v16  ;;  %v1716_v20 = vrot.slane %v1715_v35, 4  ;;  %v1865_v30 = vrot.slane %v1838_v6, 5  ;;  %v1100_v15 = vsel %vm3948_vm13, %v3921_v13, %v1099_v11  ;;  %v4098_v6 = vld [vmem:[#allocation2 + $0x1c] sm:$0xf]  ;;  %s2989_s11 = scalar_lea.vmem %s2988_s5, 2048  ;;  %p2990_p13 = scmp.lt.s32.totalorder %s4383_s18, %s2988_s5 }
 0x253   : > { %v1726_v26 = vrot.slane %v1725_v4, 4  ;;  %v1863_v7 = vsel %vm4016_vm2, %v2501_v21, %v1862_v22  ;;  %v1864_v31 = vrot.slane %v1862_v22, 4  ;;  %1101 = vst [vmem:[#allocation2 + $0x24] sm:$0xf] %v1100_v15  ;;  %v1142_v46 = vmul.bf16 %v3737_v25, %v1122_v19  ;;  %p2991_p1 = scmp.lt.s32.totalorder %s2989_s11, %s2983_s13 }
 0x254   : > { %v1143_v38 = vmul.bf16 %v3737_v25, %v1123_v62  ;;  %v1721_v27 = vsel %vm4028_vm5, %v1716_v20, %v1720_v18  ;;  %v1174_v47 = vmul.bf16 %v3742_v28, %v1122_v19  ;;  %v1175_v13 = vmul.bf16 %v3742_v28, %v1123_v62 }
 0x255   : > { %v1731_v42 = vsel %vm4028_vm5, %v1726_v26, %v1730_v54  ;;  %v1812_v39 = vadd.bf16 %v1721_v27, %v1673_v2  ;;  %v1866_v43 = vsel %vm4016_vm2, %v1864_v31, %v1865_v30  ;;  %v1150_v3 = vadd.bf16 0, %v1142_v46  ;;  %p2992_p8 = por %p2991_p1, %p2990_p13 }
 0x256   : > { %v1813_v34 = vadd.bf16 %v1731_v42, %v1674_v23  ;;  %v1151_v29 = vadd.bf16 0, %v1143_v38  ;;  %v1176_v24 = vmul.bf16 %v3742_v28, %v1157_v40  ;;  %v1211_v5 = vshrl.u32 %v1174_v47, 16 }
 0x257   : > { %v1214_v57 = vshll.u32 %v1174_v47, 16  ;;  %v1896_v44 = vadd.bf16 %v1863_v7, %v1812_v39  ;;  %v1220_v55 = vshll.u32 %v1175_v13, 16  ;;  %v1224_v8 = vshrl.u32 %v1175_v13, 16  ;;  %p2993_p5 = pnand %p2992_p8, %p2986_p0 }
 0x258   : > { %v1897_v48 = vadd.bf16 %v1866_v43, %v1813_v34  ;;  %v1213_v10 = vrot.slane %v1211_v5, 4  ;;  %v1230_v56 = vshll.u32 %v1176_v24, 16  ;;  %v1317_v58 = vmul.bf16 %v3748_v32, %v1299_v45 }
 0x259   : > { %v1216_v52 = vrot.slane %v1214_v57, 5  ;;  %v1904_v18 = vunpack.c.l.bf16 %v1896_v44  ;;  %v1222_v2 = vrot.slane %v1220_v55, 5  ;;  %v1226_v23 = vrot.slane %v1224_v8, 4 }
 0x25a   : > { %v1905_v61 = vunpack.c.l.bf16 %v1897_v48  ;;  %v1232_v35 = vrot.slane %v1230_v56, 5  ;;  %v1318_v4 = vmul.bf16 %v3748_v32, %v1123_v62  ;;  %v1319_v54 = vmul.bf16 %v3748_v32, %v1157_v40  ;;  %v4114_v40 = vld [vmem:[#allocation2 + $0x20] sm:$0x1] }
 0x25b   : > { %v1217_v11 = vor.u32 %v1216_v52, %v1213_v10  ;;  %v4101_v19 = vadd.f32 %v4091_v50, %v1904_v18  ;;  %v1227_v22 = vor.u32 %v1226_v23, %v1222_v2  ;;  %v2488_v20 = vrot.slane %v1317_v58, 9 }
 0x25c   : > { %v4104_v21 = vadd.f32 %v4091_v50, %v1905_v61  ;;  %v1350_v30 = vrot.slane %v1318_v4, 5  ;;  %v1353_v15 = vrot.slane %v1319_v54, 5  ;;  %v1407_v7 = vmul.bf16 %v3750_v33, %v4094_v9  ;;  %v1562_v61 = vld [vmem:[#allocation2 + $0x18] sm:$0xe] }
 0x25d   : > { %v1218_v26 = vrot.slane %v1217_v11, 4  ;;  %v1939_v62 = vmul.f32 %v4101_v19, %v4101_v19  ;;  %v1228_v46 = vrot.slane %v1227_v22, 4  ;;  %v1408_v38 = vmul.bf16 %v3750_v33, %v4098_v6  ;;  %v1647_v22 = vld [vmem:[#allocation2 + $0x24] sm:$0xf] }
 0x25e   : > { %v1940_v31 = vmul.f32 %v4104_v21, %v4104_v21  ;;  %v1351_v42 = vsel %vm4016_vm2, %v2488_v20, %v1350_v30  ;;  %v1352_v47 = vrot.slane %v1350_v30, 4  ;;  %v1440_v13 = vmul.bf16 %v3753_v36, %v4094_v9 }
 0x25f   : > { %v1223_v27 = vsel %vm4028_vm5, %v1218_v26, %v1222_v2  ;;  %v1947_v39 = vmul.f32 %v1939_v62, %v4101_v19  ;;  %v1233_v43 = vsel %vm4028_vm5, %v1228_v46, %v1232_v35  ;;  %v1441_v57 = vmul.bf16 %v3753_v36, %v4098_v6 }
 0x260   : > { %v1948_v34 = vmul.f32 %v1940_v31, %v4104_v21  ;;  %v1292_v45 = vadd.bf16 %v1223_v27, %v1150_v3  ;;  %v1293_v24 = vadd.bf16 %v1233_v43, %v1151_v29  ;;  %v1354_v5 = vsel %vm4016_vm2, %v1352_v47, %v1353_v15  ;;  %v1682_v43 = vld [vmem:[#allocation2 + $0x2c] sm:$0x1] }
 0x261   : > { %v1442_v44 = vmul.bf16 %v3753_v36, %v4114_v40  ;;  %v1955_v48 = vmul.f32 0.044715, %v1947_v39  ;;  %v1474_v10 = vshrl.u32 %v1440_v13, 16  ;;  %v1477_v56 = vshll.u32 %v1440_v13, 16 }
 0x262   : > { %v1956_v55 = vmul.f32 0.044715, %v1948_v34  ;;  %v1379_v8 = vadd.bf16 %v1351_v42, %v1292_v45  ;;  %v1380_v52 = vadd.bf16 %v1354_v5, %v1293_v24  ;;  %v1483_v58 = vshll.u32 %v1441_v57, 16 }
 0x263   : > { %v1487_v18 = vshrl.u32 %v1441_v57, 16  ;;  %v1963_v3 = vadd.f32 %v1955_v48, %v4101_v19  ;;  %v1476_v23 = vrot.slane %v1474_v10, 4  ;;  %v1479_v35 = vrot.slane %v1477_v56, 5 }
 0x264   : > { %v1964_v29 = vadd.f32 %v1956_v55, %v4104_v21  ;;  %v1415_v2 = vadd.bf16 %v1407_v7, %v1379_v8  ;;  %v1416_v11 = vadd.bf16 %v1408_v38, %v1380_v52  ;;  %v1485_v4 = vrot.slane %v1483_v58, 5  ;;  %v1648_v7 = vld [vmem:[#allocation2 + $0x28] sm:$0xf] }
 0x265   : > { %v1489_v54 = vrot.slane %v1487_v18, 4  ;;  %v1971_v20 = vmul.f32 0.7978846, %v1963_v3  ;;  %v1493_v30 = vshll.u32 %v1442_v44, 16  ;;  %v1579_v15 = vmul.bf16 %v3789_v17, %v1562_v61  ;;  %v1821_v18 = vld [vmem:[#allocation2 + $0x24] sm:$0xe] }
 0x266   : > { %v1972_v26 = vmul.f32 0.7978846, %v1964_v29  ;;  %v1480_v62 = vor.u32 %v1479_v35, %v1476_v23  ;;  %v1580_v46 = vmul.bf16 %v3789_v17, %v4098_v6  ;;  %v1581_v27 = vmul.bf16 %v3789_v17, %v4114_v40 }
 0x267   : > { %v1490_v31 = vor.u32 %v1489_v54, %v1485_v4  ;;  %2821 = vtanh.f32 %v1971_v20  ;;  %v1495_v38 = vrot.slane %v1493_v30, 5  ;;  %v2495_v42 = vrot.slane %v1579_v15, 9 }
 0x268   : > { %v1667_v47 = vmul.bf16 %v3826_v59, %v1647_v22  ;;  %2823 = vtanh.f32 %v1972_v26  ;;  %v1481_v13 = vrot.slane %v1480_v62, 4  ;;  %v1609_v34 = vrot.slane %v1580_v46, 5 }
 0x269   : > { %v1491_v39 = vrot.slane %v1490_v31, 4  ;;  %v1612_v45 = vrot.slane %v1581_v27, 5  ;;  %v1668_v24 = vmul.bf16 %v3826_v59, %v1648_v7  ;;  %v1699_v5 = vmul.bf16 %v3828_v63, %v1647_v22 }
 0x26a   : > { %v1700_v57 = vmul.bf16 %v3828_v63, %v1648_v7  ;;  %v1486_v44 = vsel %vm4028_vm5, %v1481_v13, %v1485_v4  ;;  %v1610_v55 = vsel %vm4016_vm2, %v2495_v42, %v1609_v34  ;;  %v1611_v8 = vrot.slane %v1609_v34, 4  ;;  %v1106_v13 = vld [vmem:[#allocation2 + $0x30] sm:$0xf] }
 0x26b   : > { %v1496_v48 = vsel %vm4028_vm5, %v1491_v39, %v1495_v38  ;;  %v1555_v10 = vadd.bf16 %v1486_v44, %v1415_v2  ;;  %v1701_v56 = vmul.bf16 %v3828_v63, %v1682_v43  ;;  %v1733_v58 = vshrl.u32 %v1699_v5, 16  ;;  %v1124_v44 = vld [vmem:[#allocation2 + $0x18] sm:$0xf] }
 0x26c   : > { %v1556_v52 = vadd.bf16 %v1496_v48, %v1416_v11  ;;  %v1613_v61 = vsel %vm4016_vm2, %v1611_v8, %v1612_v45  ;;  %v1736_v3 = vshll.u32 %v1699_v5, 16  ;;  %v1742_v29 = vshll.u32 %v1700_v57, 16 }
 0x26d   : > { %v1746_v23 = vshrl.u32 %v1700_v57, 16  ;;  %v1638_v35 = vadd.bf16 %v1610_v55, %v1555_v10  ;;  %v1735_v54 = vrot.slane %v1733_v58, 4  ;;  %v1752_v22 = vshll.u32 %v1701_v56, 16 }
 0x26e   : > { %v1639_v4 = vadd.bf16 %v1613_v61, %v1556_v52  ;;  %v1738_v20 = vrot.slane %v1736_v3, 5  ;;  %v1744_v26 = vrot.slane %v1742_v29, 5  ;;  %v1839_v2 = vmul.bf16 %v3867_v51, %v1821_v18  ;;  %v4163_v52 = vld [vmem:[#allocation2 + $0x1c] sm:$0xf] }
 0x26f   : > { %v1748_v30 = vrot.slane %v1746_v23, 4  ;;  %v1929_v11 = vunpack.c.l.bf16 %v4011_v1  ;;  %v1675_v15 = vadd.bf16 %v1667_v47, %v1638_v35  ;;  %v1840_v31 = vmul.bf16 %v3867_v51, %v1648_v7 }
 0x270   : > { %v1676_v62 = vadd.bf16 %v1668_v24, %v1639_v4  ;;  %v1739_v46 = vor.u32 %v1738_v20, %v1735_v54  ;;  %v1754_v38 = vrot.slane %v1752_v22, 5  ;;  %v1841_v42 = vmul.bf16 %v3867_v51, %v1682_v43 }
 0x271   : > { %v1749_v27 = vor.u32 %v1748_v30, %v1744_v26  ;;  %v2822_v39 = vpop.eup %2821  ;;  %v2502_v34 = vrot.slane %v1839_v2, 9  ;;  %v1869_v45 = vrot.slane %v1840_v31, 5  ;;  %v1930_v5 = vunpack.c.l.bf16 %v4094_v9 }
 0x272   : > { %v1932_v57 = vunpack.c.l.bf16 %v4114_v40  ;;  %v2824_v48 = vpop.eup %2823  ;;  %v1987_v1 = vadd.f32 1.0, %v2822_v39  ;;  %v1740_v47 = vrot.slane %v1739_v46, 4  ;;  %v1872_v55 = vrot.slane %v1841_v42, 5 }
 0x273   : > { %v1750_v24 = vrot.slane %v1749_v27, 4  ;;  %v1988_v7 = vadd.f32 1.0, %v2824_v48  ;;  %v1870_v8 = vsel %vm4016_vm2, %v2502_v34, %v1869_v45  ;;  %v1871_v10 = vrot.slane %v1869_v45, 4 }
 0x274   : > { %v1107_v43 = vsel %vm3948_vm13, %v4066_v0, %v1106_v13  ;;  %v1995_v56 = vmul.f32 0.5, %v1987_v1  ;;  %v1745_v58 = vsel %vm4028_vm5, %v1740_v47, %v1744_v26  ;;  %v1144_v61 = vmul.bf16 %v3737_v25, %v1124_v44  ;;  %v4172_v0 = vld [vmem:[#allocation2 + $0x20] sm:$0x1] }
 0x275   : > { %v1755_v18 = vsel %vm4028_vm5, %v1750_v24, %v1754_v38  ;;  %1108 = vst [vmem:[#allocation2 + $0x30] sm:$0xf] %v1107_v43  ;;  %v1996_v3 = vmul.f32 0.5, %v1988_v7  ;;  %v1814_v29 = vadd.bf16 %v1745_v58, %v1675_v15  ;;  %v1873_v35 = vsel %vm4016_vm2, %v1871_v10, %v1872_v55  ;;  %v1300_v24 = vld [vmem:[#allocation2 + $0x18] sm:$0xe] }
 0x276   : > { %v1815_v23 = vadd.bf16 %v1755_v18, %v1676_v62  ;;  %v2003_v4 = vmul.f32 %v1995_v56, %v4101_v19  ;;  %v1145_v54 = vmul.bf16 %v3737_v25, %v4163_v52  ;;  %v1152_v22 = vadd.bf16 0, %v1144_v61 }
 0x277   : > { %v1177_v20 = vmul.bf16 %v3742_v28, %v1124_v44  ;;  %v2004_v26 = vmul.f32 %v1996_v3, %v4104_v21  ;;  %v1898_v30 = vadd.bf16 %v1870_v8, %v1814_v29  ;;  %v1178_v15 = vmul.bf16 %v3742_v28, %v4163_v52 }
 0x278   : > { %v1899_v2 = vadd.bf16 %v1873_v35, %v1815_v23  ;;  %v2020_v62 = vrot.slane %v2003_v4, 7  ;;  %v4181_v31 = vadd.bf16 0, %v1145_v54  ;;  %v1179_v46 = vmul.bf16 %v3742_v28, %v4172_v0 }
 0x279   : > { %v1235_v19 = vshrl.u32 %v1177_v20, 16  ;;  %v2021_v27 = vrot.slane %v2004_v26, 7  ;;  %v1906_v38 = vunpack.c.l.bf16 %v1898_v30  ;;  %v1238_v13 = vshll.u32 %v1177_v20, 16 }
 0x27a   : > { %v1907_v42 = vunpack.c.l.bf16 %v1899_v2  ;;  %v2044_v39 = vadd.f32 %v2020_v62, %v1927_v60  ;;  %v1244_v34 = vshll.u32 %v1178_v15, 16  ;;  %v1248_v45 = vshrl.u32 %v1178_v15, 16 }
 0x27b   : > { %v1237_v21 = vrot.slane %v1235_v19, 4  ;;  %v2022_v44 = vsel %vm877_vm1, %v2020_v62, %v2021_v27  ;;  %v2046_v48 = vadd.f32 %v2021_v27, %v1929_v11  ;;  %v4189_v1 = vadd.f32 %v4091_v50, %v1906_v38  ;;  %v4211_v27 = vld [vmem:[#allocation2 + $0x24] sm:$0xf] }
 0x27c   : > { %v4192_v47 = vadd.f32 %v4091_v50, %v1907_v42  ;;  %v2045_v55 = vadd.f32 %v2022_v44, %v1928_v53  ;;  %v2069_v7 = vrot.slane %v2044_v39, 1  ;;  %v1240_v8 = vrot.slane %v1238_v13, 5  ;;  %v4217_v39 = vld [vmem:[#allocation2 + $0x28] sm:$0xf]  ;;  %v4222_v44 = vld [vmem:[#allocation2 + $0x2c] sm:$0x1] }
 0x27d   : > { %v1246_v49 = vrot.slane %v1244_v34, 5  ;;  %v2072_v60 = vrot.slane %v2046_v48, 1  ;;  %v1941_v10 = vmul.f32 %v4189_v1, %v4189_v1  ;;  %v1250_v43 = vrot.slane %v1248_v45, 4 }
 0x27e   : > { %v1942_v11 = vmul.f32 %v4192_v47, %v4192_v47  ;;  %v2070_v56 = vrot.slane %v2045_v55, 1  ;;  %v1241_v58 = vor.u32 %v1240_v8, %v1237_v21  ;;  %v1254_v18 = vshll.u32 %v1179_v46, 16 }
 0x27f   : > { %v1320_v61 = vmul.bf16 %v3748_v32, %v1300_v24  ;;  %v1949_v3 = vmul.f32 %v1941_v10, %v4189_v1  ;;  %v1251_v53 = vor.u32 %v1250_v43, %v1246_v49  ;;  %v1321_v29 = vmul.bf16 %v3748_v32, %v4163_v52 }
 0x280   : > { %v1950_v16 = vmul.f32 %v1942_v11, %v4192_v47  ;;  %v2071_v23 = vsel %vm2068_vm6, %v2069_v7, %v2070_v56  ;;  %v2073_v35 = vsel %vm2068_vm6, %v2070_v56, %v2072_v60  ;;  %v1242_v4 = vrot.slane %v1241_v58, 4  ;;  %v1563_v60 = vld [vmem:[#allocation2 + $0x24] sm:$0xe] }
 0x281   : > { %v1256_v54 = vrot.slane %v1254_v18, 5  ;;  %v2097_v20 = vpack.c.bf16 %v2073_v35, %v2071_v23  ;;  %v1957_v26 = vmul.f32 0.044715, %v1949_v3  ;;  %v1252_v2 = vrot.slane %v1251_v53, 4  ;;  %v1650_v23 = vld [vmem:[#allocation2 + $0x34] sm:$0xf] }
 0x282   : > { %v1958_v30 = vmul.f32 0.044715, %v1950_v16  ;;  %v1247_v15 = vsel %vm4028_vm5, %v1242_v4, %v1246_v49  ;;  %v1322_v62 = vmul.bf16 %v3748_v32, %v4172_v0  ;;  %v2489_v46 = vrot.slane %v1320_v61, 9 }
 0x283   : > { %v1357_v19 = vrot.slane %v1321_v29, 5  ;;  %2606 = vmatprep.mubr.bf16.mxu1 %v2097_v20  ;;  %v1965_v52 = vadd.f32 %v1957_v26, %v4189_v1  ;;  %v1257_v42 = vsel %vm4028_vm5, %v1252_v2, %v1256_v54  ;;  %v1294_v13 = vadd.bf16 %v1247_v15, %v1152_v22  ;;  %v1649_v29 = vld [vmem:[#allocation2 + $0x30] sm:$0xf] }
 0x284   : > { %v1966_v38 = vadd.f32 %v1958_v30, %v4192_v47  ;;  %v1295_v21 = vadd.bf16 %v1257_v42, %v4181_v31  ;;  %v1360_v45 = vrot.slane %v1322_v62, 5  ;;  %v1409_v7 = vmul.bf16 %v3750_v33, %v4211_v27  ;;  %v1683_v62 = vld [vmem:[#allocation2 + $0x38] sm:$0x1] }
 0x285   : > { %v1358_v0 = vsel %vm4016_vm2, %v2489_v46, %v1357_v19  ;;  %v1359_v34 = vrot.slane %v1357_v19, 4  ;;  %v1973_v48 = vmul.f32 0.7978846, %v1965_v52  ;;  %v1410_v8 = vmul.bf16 %v3750_v33, %v4217_v39 }
 0x286   : > { %v1974_v24 = vmul.f32 0.7978846, %v1966_v38  ;;  %v1381_v55 = vadd.bf16 %v1358_v0, %v1294_v13  ;;  %v1443_v31 = vmul.bf16 %v3753_v36, %v4211_v27  ;;  %v1444_v49 = vmul.bf16 %v3753_v36, %v4217_v39 }
 0x287   : > { %v1361_v22 = vsel %vm4016_vm2, %v1359_v34, %v1360_v45  ;;  %2825 = vtanh.f32 %v1973_v48  ;;  %v1445_v43 = vmul.bf16 %v3753_v36, %v4222_v44  ;;  %v1582_v53 = vmul.bf16 %v3789_v17, %v1563_v60 }
 0x288   : > { %v1382_v10 = vadd.bf16 %v1361_v22, %v1295_v21  ;;  %v1417_v11 = vadd.bf16 %v1409_v7, %v1381_v55  ;;  %2827 = vtanh.f32 %v1974_v24  ;;  %v1498_v56 = vshrl.u32 %v1443_v31, 16 }
 0x289   : > { %v1501_v58 = vshll.u32 %v1443_v31, 16  ;;  %v1507_v18 = vshll.u32 %v1444_v49, 16  ;;  %v1511_v3 = vshrl.u32 %v1444_v49, 16  ;;  %v1517_v16 = vshll.u32 %v1445_v43, 16 }
 0x28a   : > { %v1418_v61 = vadd.bf16 %v1410_v8, %v1382_v10  ;;  %v1500_v35 = vrot.slane %v1498_v56, 4  ;;  %v1583_v20 = vmul.bf16 %v3789_v17, %v4217_v39  ;;  %v1584_v2 = vmul.bf16 %v3789_v17, %v4222_v44 }
 0x28b   : > { %v1503_v4 = vrot.slane %v1501_v58, 5  ;;  %v1509_v54 = vrot.slane %v1507_v18, 5  ;;  %v1513_v26 = vrot.slane %v1511_v3, 4  ;;  %v1519_v30 = vrot.slane %v1517_v16, 5  ;;  %v1822_v16 = vld [vmem:[#allocation2 + $0x30] sm:$0xe] }
 0x28c   : > { %v2496_v15 = vrot.slane %v1582_v53, 9  ;;  %v1616_v19 = vrot.slane %v1583_v20, 5  ;;  %v1669_v52 = vmul.bf16 %v3826_v59, %v1649_v29  ;;  %v1670_v38 = vmul.bf16 %v3826_v59, %v1650_v23 }
 0x28d   : > { %v1504_v46 = vor.u32 %v1503_v4, %v1500_v35  ;;  %v1514_v42 = vor.u32 %v1513_v26, %v1509_v54  ;;  %v1619_v13 = vrot.slane %v1584_v2, 5  ;;  %v1702_v21 = vmul.bf16 %v3828_v63, %v1649_v29 }
 0x28e   : > { %v1703_v0 = vmul.bf16 %v3828_v63, %v1650_v23  ;;  %v1617_v45 = vsel %vm4016_vm2, %v2496_v15, %v1616_v19  ;;  %v1618_v48 = vrot.slane %v1616_v19, 4  ;;  %v1704_v24 = vmul.bf16 %v3828_v63, %v1683_v62 }
 0x28f   : > { %v1505_v34 = vrot.slane %v1504_v46, 4  ;;  %v1515_v55 = vrot.slane %v1514_v42, 4  ;;  %v1757_v7 = vshrl.u32 %v1702_v21, 16  ;;  %v1760_v22 = vshll.u32 %v1702_v21, 16 }
 0x290   : > { %v1766_v8 = vshll.u32 %v1703_v0, 16  ;;  %v1620_v49 = vsel %vm4016_vm2, %v1618_v48, %v1619_v13  ;;  %v1770_v60 = vshrl.u32 %v1703_v0, 16  ;;  %v1776_v10 = vshll.u32 %v1704_v24, 16 }
 0x291   : > { %v1510_v31 = vsel %vm4028_vm5, %v1505_v34, %v1509_v54  ;;  %v2826_v43 = vpop.eup %2825  ;;  %v1520_v56 = vsel %vm4028_vm5, %v1515_v55, %v1519_v30  ;;  %v1759_v18 = vrot.slane %v1757_v7, 4  ;;  %v1762_v3 = vrot.slane %v1760_v22, 5 }
 0x292   : > { %v1557_v58 = vadd.bf16 %v1510_v31, %v1417_v11  ;;  %v2828_v53 = vpop.eup %2827  ;;  %v1989_v29 = vadd.f32 1.0, %v2826_v43  ;;  %v1558_v35 = vadd.bf16 %v1520_v56, %v1418_v61  ;;  %v1768_v4 = vrot.slane %v1766_v8, 5  ;;  %v1113_v56 = vld [vmem:[#allocation2 + $0x3c] sm:$0xf] }
 0x293   : > { %v1772_v20 = vrot.slane %v1770_v60, 4  ;;  %v1990_v26 = vadd.f32 1.0, %v2828_v53  ;;  %v1763_v2 = vor.u32 %v1762_v3, %v1759_v18  ;;  %v1778_v15 = vrot.slane %v1776_v10, 5  ;;  %v1127_v18 = vld [vmem:[#allocation2 + $0x28] sm:$0xf] }
 0x294   : > { %v1640_v54 = vadd.bf16 %v1617_v45, %v1557_v58  ;;  %v1997_v46 = vmul.f32 0.5, %v1989_v29  ;;  %v1641_v19 = vadd.bf16 %v1620_v49, %v1558_v35  ;;  %v1842_v13 = vmul.bf16 %v3867_v51, %v1822_v16  ;;  %v1126_v58 = vld [vmem:[#allocation2 + $0x24] sm:$0xf] }
 0x295   : > { %v1773_v42 = vor.u32 %v1772_v20, %v1768_v4  ;;  %v1998_v21 = vmul.f32 0.5, %v1990_v26  ;;  %v1764_v11 = vrot.slane %v1763_v2, 4  ;;  %v1843_v0 = vmul.bf16 %v3867_v51, %v1650_v23 }
 0x296   : > { %v1677_v30 = vadd.bf16 %v1669_v52, %v1640_v54  ;;  %v2005_v34 = vmul.f32 %v1997_v46, %v4189_v1  ;;  %v1678_v48 = vadd.bf16 %v1670_v38, %v1641_v19  ;;  %v1844_v24 = vmul.bf16 %v3867_v51, %v1683_v62 }
 0x297   : > { %v1774_v61 = vrot.slane %v1773_v42, 4  ;;  %v2006_v45 = vmul.f32 %v1998_v21, %v4192_v47  ;;  %v1769_v55 = vsel %vm4028_vm5, %v1764_v11, %v1768_v4  ;;  %v2503_v7 = vrot.slane %v1842_v13, 9  ;;  %v1159_v4 = vld [vmem:[#allocation2 + $0x2c] sm:$0x1]  ;;  %v1301_v11 = vld [vmem:[#allocation2 + $0x24] sm:$0xe] }
 0x298   : > { %v1876_v22 = vrot.slane %v1843_v0, 5  ;;  %v2023_v8 = vrot.slane %v2005_v34, 7  ;;  %v1816_v31 = vadd.bf16 %v1769_v55, %v1677_v30  ;;  %v1879_v49 = vrot.slane %v1844_v24, 5 }
 0x299   : > { %v1779_v52 = vsel %vm4028_vm5, %v1774_v61, %v1778_v15  ;;  %v2024_v23 = vrot.slane %v2006_v45, 7  ;;  %v1931_v62 = vunpack.c.l.bf16 %v4098_v6  ;;  %v1933_v43 = vunpack.c.l.bf16 %v4211_v27 }
 0x29a   : > { %v1817_v60 = vadd.bf16 %v1779_v52, %v1678_v48  ;;  %v1877_v1 = vsel %vm4016_vm2, %v2503_v7, %v1876_v22  ;;  %v1878_v38 = vrot.slane %v1876_v22, 4  ;;  %v2047_v47 = vadd.f32 %v2023_v8, %v1930_v5 }
 0x29b   : > { %v1900_v10 = vadd.bf16 %v1877_v1, %v1816_v31  ;;  %v2025_v3 = vsel %vm877_vm1, %v2023_v8, %v2024_v23  ;;  %v2049_v16 = vadd.f32 %v2024_v23, %v1932_v57  ;;  %v1934_v29 = vunpack.c.l.bf16 %v4217_v39  ;;  %v4297_v31 = vld [vmem:[#allocation2 + $0x30] sm:$0xf] }
 0x29c   : > { %v1880_v53 = vsel %vm4016_vm2, %v1878_v38, %v1879_v49  ;;  %v2048_v6 = vadd.f32 %v2025_v3, %v1931_v62  ;;  %v2074_v35 = vrot.slane %v2047_v47, 1  ;;  %v1114_v26 = vsel %vm3948_vm13, %v3984_v12, %v1113_v56  ;;  %v4300_v38 = vld [vmem:[#allocation2 + $0x34] sm:$0xf] }
 0x29d   : > { %v1901_v9 = vadd.bf16 %v1880_v53, %v1817_v60  ;;  %v1908_v5 = vunpack.c.l.bf16 %v1900_v10  ;;  %v2077_v20 = vrot.slane %v2049_v16, 1  ;;  %v1146_v54 = vmul.bf16 %v3737_v25, %v1126_v58  ;;  %1115 = vst [vmem:[#allocation2 + $0x3c] sm:$0xf] %v1114_v26 }
 0x29e   : > { %v1147_v40 = vmul.bf16 %v3737_v25, %v1127_v18  ;;  %v2075_v57 = vrot.slane %v2048_v6, 1  ;;  %v1180_v46 = vmul.bf16 %v3742_v28, %v1126_v58  ;;  %v1181_v13 = vmul.bf16 %v3742_v28, %v1127_v18 }
 0x29f   : > { %v1909_v2 = vunpack.c.l.bf16 %v1901_v9  ;;  %v4281_v15 = vadd.f32 %v4091_v50, %v1908_v5  ;;  %v1154_v19 = vadd.bf16 0, %v1146_v54  ;;  %v1182_v21 = vmul.bf16 %v3742_v28, %v1159_v4  ;;  %v4310_v54 = vld [vmem:[#allocation2 + $0x38] sm:$0x1] }
 0x2a0   : > { %v1155_v42 = vadd.bf16 0, %v1147_v40  ;;  %v2076_v37 = vsel %vm2068_vm6, %v2074_v35, %v2075_v57  ;;  %v2078_v12 = vsel %vm2068_vm6, %v2075_v57, %v2077_v20  ;;  %v1259_v34 = vshrl.u32 %v1180_v46, 16 }
 0x2a1   : > { %v4289_v25 = vadd.f32 %v4091_v50, %v1909_v2  ;;  %v1943_v30 = vmul.f32 %v4281_v15, %v4281_v15  ;;  %v2098_v0 = vpack.c.bf16 %v2078_v12, %v2076_v37  ;;  %v1262_v48 = vshll.u32 %v1180_v46, 16 }
 0x2a2   : > { %v1268_v61 = vshll.u32 %v1181_v13, 16  ;;  %v1272_v45 = vshrl.u32 %v1181_v13, 16  ;;  %v1278_v55 = vshll.u32 %v1182_v21, 16  ;;  %v1261_v7 = vrot.slane %v1259_v34, 4 }
 0x2a3   : > { %v1944_v24 = vmul.f32 %v4289_v25, %v4289_v25  ;;  %v1951_v28 = vmul.f32 %v1943_v30, %v4281_v15  ;;  %2607 = vmatmul.mubr.bf16.vlgmr.msra.gmra.mrb[0].mxu1 %v2098_v0  ;;  %v1264_v22 = vrot.slane %v1262_v48, 5  ;;  %v1323_v52 = vmul.bf16 %v3748_v32, %v1301_v11  ;;  %v1564_v11 = vld [vmem:[#allocation2 + $0x30] sm:$0xe] }
 0x2a4   : > { %v1270_v8 = vrot.slane %v1268_v61, 5  ;;  %v1274_v60 = vrot.slane %v1272_v45, 4  ;;  %v1280_v1 = vrot.slane %v1278_v55, 5  ;;  %v1324_v47 = vmul.bf16 %v3748_v32, %v1127_v18  ;;  %v1651_v55 = vld [vmem:[#allocation2 + $0x3c] sm:$0xf] }
 0x2a5   : > { %v1952_v49 = vmul.f32 %v1944_v24, %v4289_v25  ;;  %v1959_v23 = vmul.f32 0.044715, %v1951_v28  ;;  %v1265_v62 = vor.u32 %v1264_v22, %v1261_v7  ;;  %v1325_v10 = vmul.bf16 %v3748_v32, %v1159_v4 }
 0x2a6   : > { %v2490_v56 = vrot.slane %v1323_v52, 9  ;;  %v1275_v16 = vor.u32 %v1274_v60, %v1270_v8  ;;  %v1411_v53 = vmul.bf16 %v3750_v33, %v4297_v31  ;;  %v1364_v35 = vrot.slane %v1324_v47, 5  ;;  %v4329_v60 = vld [vmem:[#allocation2 + $0x44] sm:$0x1] }
 0x2a7   : > { %v1960_v58 = vmul.f32 0.044715, %v1952_v49  ;;  %v1967_v3 = vadd.f32 %v1959_v23, %v4281_v15  ;;  %v1266_v6 = vrot.slane %v1265_v62, 4  ;;  %v1367_v9 = vrot.slane %v1325_v10, 5 }
 0x2a8   : > { %v1412_v5 = vmul.bf16 %v3750_v33, %v4300_v38  ;;  %v1276_v18 = vrot.slane %v1275_v16, 4  ;;  %v1446_v32 = vmul.bf16 %v3753_v36, %v4297_v31  ;;  %v1365_v40 = vsel %vm4016_vm2, %v2490_v56, %v1364_v35 }
 0x2a9   : > { %v1968_v20 = vadd.f32 %v1960_v58, %v4289_v25  ;;  %v1975_v26 = vmul.f32 0.7978846, %v1967_v3  ;;  %v1271_v4 = vsel %vm4028_vm5, %v1266_v6, %v1270_v8  ;;  %v1366_v57 = vrot.slane %v1364_v35, 4  ;;  %v1652_v8 = vld [vmem:[#allocation2 + $0x40] sm:$0xf] }
 0x2aa   : > { %v1447_v2 = vmul.bf16 %v3753_v36, %v4300_v38  ;;  %v1281_v46 = vsel %vm4028_vm5, %v1276_v18, %v1280_v1  ;;  %v1296_v13 = vadd.bf16 %v1271_v4, %v1154_v19  ;;  %v1448_v12 = vmul.bf16 %v3753_v36, %v4310_v54 }
 0x2ab   : > { %v1976_v33 = vmul.f32 0.7978846, %v1968_v20  ;;  %2829 = vtanh.f32 %v1975_v26  ;;  %v1297_v21 = vadd.bf16 %v1281_v46, %v1155_v42  ;;  %v1368_v37 = vsel %vm4016_vm2, %v1366_v57, %v1367_v9  ;;  %v1823_v46 = vld [vmem:[#allocation2 + $0x3c] sm:$0xe] }
 0x2ac   : > { %v1522_v30 = vshrl.u32 %v1446_v32, 16  ;;  %v1383_v0 = vadd.bf16 %v1365_v40, %v1296_v13  ;;  %v1525_v34 = vshll.u32 %v1446_v32, 16  ;;  %v1531_v48 = vshll.u32 %v1447_v2, 16 }
 0x2ad   : > { %2831 = vtanh.f32 %v1976_v33  ;;  %v1384_v61 = vadd.bf16 %v1368_v37, %v1297_v21  ;;  %v1535_v28 = vshrl.u32 %v1447_v2, 16  ;;  %v1541_v45 = vshll.u32 %v1448_v12, 16 }
 0x2ae   : > { %v1524_v24 = vrot.slane %v1522_v30, 4  ;;  %v1419_v7 = vadd.bf16 %v1411_v53, %v1383_v0  ;;  %v1527_v19 = vrot.slane %v1525_v34, 5  ;;  %v1533_v42 = vrot.slane %v1531_v48, 5 }
 0x2af   : > { %v1585_v22 = vmul.bf16 %v3789_v17, %v1564_v11  ;;  %v1420_v52 = vadd.bf16 %v1412_v5, %v1384_v61  ;;  %v1537_v49 = vrot.slane %v1535_v28, 4  ;;  %v1543_v36 = vrot.slane %v1541_v45, 5 }
 0x2b0   : > { %v1586_v23 = vmul.bf16 %v3789_v17, %v4300_v38  ;;  %v1528_v1 = vor.u32 %v1527_v19, %v1524_v24  ;;  %v1587_v62 = vmul.bf16 %v3789_v17, %v4310_v54  ;;  %v1671_v10 = vmul.bf16 %v3826_v59, %v1651_v55 }
 0x2b1   : > { %v2497_v47 = vrot.slane %v1585_v22, 9  ;;  %v1538_v56 = vor.u32 %v1537_v49, %v1533_v42  ;;  %v1672_v3 = vmul.bf16 %v3826_v59, %v1652_v8  ;;  %v1705_v16 = vmul.bf16 %v3828_v63, %v1651_v55 }
 0x2b2   : > { %v1623_v58 = vrot.slane %v1586_v23, 5  ;;  %v1529_v53 = vrot.slane %v1528_v1, 4  ;;  %v1626_v6 = vrot.slane %v1587_v62, 5  ;;  %v1706_v35 = vmul.bf16 %v3828_v63, %v1652_v8 }
 0x2b3   : > { %v1707_v9 = vmul.bf16 %v3828_v63, %v4329_v60  ;;  %v1539_v5 = vrot.slane %v1538_v56, 4  ;;  %v1781_v26 = vshrl.u32 %v1705_v16, 16  ;;  %v1784_v59 = vshll.u32 %v1705_v16, 16 }
 0x2b4   : > { %v1624_v17 = vsel %vm4016_vm2, %v2497_v47, %v1623_v58  ;;  %v1625_v20 = vrot.slane %v1623_v58, 4  ;;  %v1534_v32 = vsel %vm4028_vm5, %v1529_v53, %v1533_v42  ;;  %v1790_v4 = vshll.u32 %v1706_v35, 16 }
 0x2b5   : > { %v2830_v18 = vpop.eup %2829  ;;  %v1794_v40 = vshrl.u32 %v1706_v35, 16  ;;  %v1544_v2 = vsel %vm4028_vm5, %v1539_v5, %v1543_v36  ;;  %v1559_v33 = vadd.bf16 %v1534_v32, %v1419_v7  ;;  %v1783_v37 = vrot.slane %v1781_v26, 4 }
 0x2b6   : > { %v1991_v57 = vadd.f32 1.0, %v2830_v18  ;;  %v1627_v63 = vsel %vm4016_vm2, %v1625_v20, %v1626_v6  ;;  %v1560_v21 = vadd.bf16 %v1544_v2, %v1420_v52  ;;  %v1786_v12 = vrot.slane %v1784_v59, 5 }
 0x2b7   : > { %v2832_v13 = vpop.eup %2831  ;;  %v1792_v30 = vrot.slane %v1790_v4, 5  ;;  %v1642_v34 = vadd.bf16 %v1624_v17, %v1559_v33  ;;  %v1796_v48 = vrot.slane %v1794_v40, 4  ;;  %v1800_v28 = vshll.u32 %v1707_v9, 16 }
 0x2b8   : > { %v1992_v11 = vadd.f32 1.0, %v2832_v13  ;;  %v1999_v0 = vmul.f32 0.5, %v1991_v57  ;;  %v1643_v61 = vadd.bf16 %v1627_v63, %v1560_v21  ;;  %v1787_v24 = vor.u32 %v1786_v12, %v1783_v37 }
 0x2b9   : > { %v1845_v45 = vmul.bf16 %v3867_v51, %v1823_v46  ;;  %v1679_v19 = vadd.bf16 %v1671_v10, %v1642_v34  ;;  %v1797_v42 = vor.u32 %v1796_v48, %v1792_v30  ;;  %v1802_v52 = vrot.slane %v1800_v28, 5 }
 0x2ba   : > { %v2000_v55 = vmul.f32 0.5, %v1992_v11  ;;  %v2007_v7 = vmul.f32 %v1999_v0, %v4281_v15  ;;  %v1680_v22 = vadd.bf16 %v1672_v3, %v1643_v61  ;;  %v1788_v49 = vrot.slane %v1787_v24, 4 }
 0x2bb   : > { %v1846_v36 = vmul.bf16 %v3867_v51, %v1652_v8  ;;  %v1798_v62 = vrot.slane %v1797_v42, 4  ;;  %v1847_v47 = vmul.bf16 %v3867_v51, %v4329_v60  ;;  %v1935_v56 = vunpack.c.l.bf16 %v4222_v44 }
 0x2bc   : > { %v2008_v23 = vmul.f32 %v2000_v55, %v4289_v25  ;;  %v2026_v1 = vrot.slane %v2007_v7, 7  ;;  %v1793_v58 = vsel %vm4028_vm5, %v1788_v49, %v1792_v30  ;;  %v2504_v15 = vrot.slane %v1845_v45, 9 }
 0x2bd   : > { %v1883_v10 = vrot.slane %v1846_v36, 5  ;;  %v1803_v8 = vsel %vm4028_vm5, %v1798_v62, %v1802_v52  ;;  %v1818_v25 = vadd.bf16 %v1793_v58, %v1679_v19  ;;  %v1886_v60 = vrot.slane %v1847_v47, 5 }
 0x2be   : > { %v2027_v16 = vrot.slane %v2008_v23, 7  ;;  %v2050_v3 = vadd.f32 %v2026_v1, %v1933_v43  ;;  %v1819_v53 = vadd.bf16 %v1803_v8, %v1680_v22  ;;  %v1936_v28 = vunpack.c.l.bf16 %v4297_v31  ;;  %v2506_v31 = vld [vmem:[%s4600_s27] ss:$0 sm:$0xff] }
 0x2bf   : > { %v1884_v6 = vsel %vm4016_vm2, %v2504_v15, %v1883_v10  ;;  %v1885_v51 = vrot.slane %v1883_v10, 4  ;;  %v1938_v45 = vunpack.c.l.bf16 %v4310_v54  ;;  %v1937_v7 = vunpack.c.l.bf16 %v4300_v38 }
 0x2c0   : > { %v2028_v44 = vsel %vm877_vm1, %v2026_v1, %v2027_v16  ;;  %v2052_v35 = vadd.f32 %v2027_v16, %v1935_v56  ;;  %v1902_v9 = vadd.bf16 %v1884_v6, %v1818_v25  ;;  %v2079_v20 = vrot.slane %v2050_v3, 1 }
 0x2c1   : > { %v2051_v5 = vadd.f32 %v2028_v44, %v1934_v29  ;;  %v1887_v27 = vsel %vm4016_vm2, %v1885_v51, %v1886_v60 }
 0x2c2   : > { %v2082_v43 = vrot.slane %v2052_v35, 1  ;;  %v1903_v41 = vadd.bf16 %v1887_v27, %v1819_v53  ;;  %v1910_v17 = vunpack.c.l.bf16 %v1902_v9 }
 0x2c3   : > { %v2080_v26 = vrot.slane %v2051_v5, 1 }
 0x2c4   : > { %v1911_v18 = vunpack.c.l.bf16 %v1903_v41  ;;  %v1925_v32 = vadd.f32 %v4091_v50, %v1910_v17 }
 0x2c5   : > { %v2081_v59 = vsel %vm2068_vm6, %v2079_v20, %v2080_v26  ;;  %v2083_v4 = vsel %vm2068_vm6, %v2080_v26, %v2082_v43 }
 0x2c6   : > { %v2099_v40 = vpack.c.bf16 %v2083_v4, %v2081_v59  ;;  %v1926_v57 = vadd.f32 %v4091_v50, %v1911_v18  ;;  %v1945_v39 = vmul.f32 %v1925_v32, %v1925_v32 }
 0x2c8   : > { %2610 = vmatprep.mubr.bf16.mxu1 %v2099_v40  ;;  %v1946_v29 = vmul.f32 %v1926_v57, %v1926_v57  ;;  %v1953_v14 = vmul.f32 %v1945_v39, %v1925_v32 }
 0x2ca   : > { %v1954_v2 = vmul.f32 %v1946_v29, %v1926_v57  ;;  %v1961_v33 = vmul.f32 0.044715, %v1953_v14 }
 0x2cc   : > { %v1962_v63 = vmul.f32 0.044715, %v1954_v2  ;;  %v1969_v46 = vadd.f32 %v1961_v33, %v1925_v32 }
 0x2ce   : > { %v1970_v13 = vadd.f32 %v1962_v63, %v1926_v57  ;;  %v1977_v21 = vmul.f32 0.7978846, %v1969_v46 }
 0x2d0   : > { %v1978_v37 = vmul.f32 0.7978846, %v1970_v13  ;;  %2833 = vtanh.f32 %v1977_v21 }
 0x2d2   : > { %2835 = vtanh.f32 %v1978_v37 }
 0x2da   : > { %v2834_v12 = vpop.eup %2833 }
 0x2db   : > { %v1993_v30 = vadd.f32 1.0, %v2834_v12 }
 0x2dc   : > { %v2836_v11 = vpop.eup %2835 }
 0x2dd   : > { %v1994_v0 = vadd.f32 1.0, %v2836_v11  ;;  %v2001_v34 = vmul.f32 0.5, %v1993_v30 }
 0x2df   : > { %v2002_v48 = vmul.f32 0.5, %v1994_v0  ;;  %v2009_v50 = vmul.f32 %v2001_v34, %v1925_v32 }
 0x2e1   : > { %v2010_v61 = vmul.f32 %v2002_v48, %v1926_v57  ;;  %v2029_v24 = vrot.slane %v2009_v50, 7 }
 0x2e3   : > { %v2030_v55 = vrot.slane %v2010_v61, 7  ;;  %v2053_v19 = vadd.f32 %v2029_v24, %v1936_v28 }
 0x2e5   : > { %v2031_v42 = vsel %vm877_vm1, %v2029_v24, %v2030_v55  ;;  %v2055_v22 = vadd.f32 %v2030_v55, %v1938_v45  ;;  %v2084_v36 = vrot.slane %v2053_v19, 1 }
 0x2e6   : > { %v2054_v49 = vadd.f32 %v2031_v42, %v1937_v7 }
 0x2e7   : > { %v2087_v52 = vrot.slane %v2055_v22, 1 }
 0x2e8   : > { %v2085_v23 = vrot.slane %v2054_v49, 1 }
 0x2ea   : > { %v2086_v1 = vsel %vm2068_vm6, %v2084_v36, %v2085_v23  ;;  %v2088_v62 = vsel %vm2068_vm6, %v2085_v23, %v2087_v52 }
 0x2eb   : > { %v2100_v47 = vpack.c.bf16 %v2088_v62, %v2086_v1 }
 0x2ed   : > { %2611 = vmatmul.mubr.bf16.gmra.mrb[4].mxu1 %v2100_v47 }
 0x376   : > { %v2608_v38 = vpop.f32.mrb[0].mxu1 }
 0x377   : > { %v2215_v54 = vadd.f32 %v2608_v38, %v2506_v31  ;;  %v2206_v56 = vpop.f32.mrb[1].mxu1 }
 0x378   : > { %v2207_v58 = vadd.f32 %v2506_v31, %v2206_v56  ;;  %v2609_v15 = vpop.f32.mrb[2].mxu1 }
 0x379   : > { %2239 = vst [vmem:[%s507_s0 + $0x10] sm:$0xff] %v2215_v54  ;;  %v2218_v10 = vadd.f32 %v2609_v15, %v2506_v31  ;;  %v2209_v16 = vpop.f32.mrb[3].mxu1 }
 0x37a   : > { %2237 = vst [vmem:[%s507_s0] sm:$0xff] %v2207_v58  ;;  %v2210_v3 = vadd.f32 %v2506_v31, %v2209_v16 }
 0x37b   : > { %2240 = vst [vmem:[%s507_s0 + $0x18] sm:$0xff] %v2218_v10 }
 0x37c   : > { %2238 = vst [vmem:[%s507_s0 + $0x8] sm:$0xff] %v2210_v3 }
 0x3c0   : > { %v2612_v8 = vpop.f32.mrb[4].mxu1 }
 0x3c1   : > { %v2231_v25 = vadd.f32 %v2612_v8, %v2506_v31  ;;  %v2222_v53 = vpop.f32.mrb[5].mxu1 }
 0x3c2   : > { %v2223_v6 = vadd.f32 %v2506_v31, %v2222_v53  ;;  %v2613_v51 = vpop.f32.mrb[6].mxu1 }
 0x3c3   : > { %2243 = vst [vmem:[%s507_s0 + $0x30] sm:$0xff] %v2231_v25  ;;  %v2234_v60 = vadd.f32 %v2613_v51, %v2506_v31  ;;  %v2225_v44 = vpop.f32.mrb[7].mxu1 }
 0x3c4   : > { %2241 = vst [vmem:[%s507_s0 + $0x20] sm:$0xff] %v2223_v6  ;;  %v2226_v35 = vadd.f32 %v2506_v31, %v2225_v44 }
 0x3c5   : > { %2244 = vst [vmem:[%s507_s0 + $0x38] sm:$0xff] %v2234_v60 }
 0x3c6   : > { %2242 = vst [vmem:[%s507_s0 + $0x28] sm:$0xff] %v2226_v35 }
 0x3c7   : > { %2996 = shalt.err (!%p2993_p5)
}
 0x3c8   : > { %s2997_s21 = scalar_lea.hbm %s4388_s7, 1024  ;;  %s3001_s0 = scalar_lea.hbm %s4602_s24, 8192 }
 0x3c9   : > { %p2998_p6 = scmp.ne.s32.totalorder %s4388_s7, %s2997_s21  ;;  %p3002_p3 = scmp.lt.u32.totalorder %s4388_s7, %s4602_s24 }
 0x3ca   : > { %p3003_p7 = scmp.lt.u32.totalorder %s3001_s0, %s2997_s21  ;;  %p3005_p10 = scmp.lt.u32.totalorder %s2997_s21, %s4388_s7 }
 0x3cb   : > { %p2999_p9 = pnand %p2998_p6, %p4603_p12 }
 0x3cc   : > { %p3004_p4 = por %p3003_p7, %p3002_p3 }
 0x3cd   : > { %p3000_p11 = pneg %p2999_p9 }
 0x3ce   : > { %p3006_p2 = por %p3005_p10, %p3004_p4 }
 0x3d0   : > { %p3007_p0 = pnand %p3006_p2, %p3000_p11 }
 0x3d2   : > { %3010 = shalt.err (!%p3007_p0)
}
 0x3d3   : > { %s3151_s10 = smov 128   ;;  %s3152_s3 = smov 8  }
 0x3d4   : > { %2628 = dma.vmem_to_hbm [thread:$0]  (%p4603_p12), %s4383_s18, 1024, %s4388_s7, %s2246_s9, %s3151_s10, %s3151_s10, %s3152_s3  }
 0x3d5 PF: > { %p2656_p13 = scmp.ge.s32.totalorder %s3141_s22, 2  ;;  %s2277_s23 = sand.u32 1, %s3113_s15  }
 0x3d6   : > { %p4604_p1 = scmp.ne.s32.totalorder %s4546_s2, 0  ;;  %s2278_s1 = scalar_lea.sflag [#allocation5], %s2277_s23 }
 0x3d8   : > { %p2648_p8 = pnand %p2656_p13, %p4604_p1 }
 0x3da   : > { %3084 = dma.done.wait (!%p2648_p8), %s2278_s1, 1024  }
 0x3db   : > { %3086 = vsyncadd (!%p2648_p8), %s2278_s1, 4294966272  ;;  %s29_s22 = sadd.s32 1, %s3141_s22   ;;  %s4606_s30 = sld [smem:[#allocation19_spill]] }
 0x3dc   : > { %p4419_p5 = scmp.ge.s32.totalorder %s29_s22, 10   ;;  %s4607_s10 = sld [smem:[#allocation20_spill]] }
 0x3dd   : > { %s4608_s25 = sld [smem:[#allocation21_spill]]  ;;  %s4609_s28 = smov %s3363_s12 }
 0x3de   : > { %s4610_s18 = sld [smem:[#allocation24_spill]]  ;;  %s4611_s2 = sld [smem:[#allocation25_spill]] }
 0x3df   : > { %s4612_s20 = sld [smem:[#allocation27_spill]]  ;;  %s4613_s21 = sld [smem:[#allocation28_spill]] }
 0x3e0   : > { %s4615_s11 = smov %s4638_s19  ;;  %s4617_s13 = smov %s3109_s14 }
 0x3e1   : > { %s4618_s14 = smov %s4609_s28  ;;  %s4619_s15 = smov %s3117_s16 }
 0x3e2   : > { %s4620_s16 = smov %s3121_s17  ;;  %s4621_s17 = smov %s3454_s29 }
 0x3e3   : > { %s4616_s12 = smov %s4608_s25  ;;  %28 = sbr.rel (!%p4419_p5) target bundleno = 24 (0x18), region = 135 }
 0x3e4   : > { %s4622_s19 = smov %s4611_s2 }
 0x3ea   :  { %2283 = vsyncpa [#allocation4], 1 }
 0x3eb   :  { %2285 = vsyncpa [#allocation4 + $0x1], 1 }
 0x3ec   :  { %2286 = vsyncpa [#allocation7], 1 }
 0x3ed   :  { %2288 = vsyncpa [#allocation7 + $0x1], 1 }
 0x3ee   :  { %2289 = vsyncpa [#allocation10], 1 }
 0x3ef   :  { %2290 = vsyncpa [#allocation5], 1 }
 0x3f0   :  { %2292 = vsyncpa [#allocation5 + $0x1], 1 }

</bundles_post_ra>
